<compile_context>
chip_gen: v5e
topology: v5e:2x2
jax: 0.10.0
libtpu: 0.0.40
codegen_flags: <defaults>
</compile_context>

<pallas_src>
import functools

import jax
import jax.numpy as jnp
from jax import lax
from jax.experimental import pallas as pl
from jax.experimental.pallas import tpu as pltpu


def _round_up(x, m):
    return (x + m - 1) // m * m


_SQRT_2_OVER_PI = 0.7978845608028654


def _gelu_tanh(x):
    # TODO(synk): torch's ACT2FN['gelu'] is exact erf-gelu; the tanh formulation
    # ('gelu_new', max abs diff ~1e-3) is used because tanh lowers cleanly to
    # the EUP on every TPU generation.
    return 0.5 * x * (1.0 + jnp.tanh(_SQRT_2_OVER_PI * (x + 0.044715 * x * x * x)))


def mlm_head_kernel(seq_ref, wt_ref, bt_ref, g_ref, be_ref, wd_ref, bv_ref,
                    out_ref, t_ref, *, eps):
    # Transform (dense + gelu + LayerNorm) once per row tile, at the first
    # vocab tile; result stays resident in VMEM scratch for all vocab tiles.
    # NOTE: this carry is only valid while the vocab axis is the innermost
    # grid axis and marked "arbitrary".
    @pl.when(pl.program_id(1) == 0)
    def _():
        # Cast the f32 row tile to the matmul dtype in-kernel (no wrapper pass).
        x = jnp.dot(seq_ref[...].astype(t_ref.dtype), wt_ref[...],
                    preferred_element_type=jnp.float32)
        x = x + bt_ref[...]
        a = _gelu_tanh(x)
        mean = jnp.mean(a, axis=-1, keepdims=True)
        cen = a - mean
        var = jnp.mean(cen * cen, axis=-1, keepdims=True)
        scale = g_ref[...] * lax.rsqrt(var + eps)      # fold gamma into rsqrt
        t_ref[...] = (cen * scale + be_ref[...]).astype(t_ref.dtype)

    # Decoder: (tm, H) @ (H, tv) + vocab-bias tile.  Ragged last vocab tile is
    # handled by Pallas (masked writeback), so no weight padding is needed.
    scores = jnp.dot(t_ref[...], wd_ref[...],
                     preferred_element_type=jnp.float32) + bv_ref[...]
    out_ref[...] = scores.astype(out_ref.dtype)


def nsp_kernel(p_ref, w_ref, b_ref, o_ref, *, matmul_dtype):
    o_ref[...] = (jnp.dot(p_ref[...].astype(matmul_dtype), w_ref[...],
                          preferred_element_type=jnp.float32)
                  + b_ref[...]).astype(o_ref.dtype)


def bert_pretraining_heads(sequence_output, pooled_output,
                           wt, bt, gamma, beta, wd, bv, wn, bn,
                           *, eps=1e-12, tm=1024, tv=1024,
                           matmul_dtype=jnp.bfloat16, scores_dtype=None):
    """Forward of BertPreTrainingHeads.

    sequence_output: [B, S, H]      pooled_output: [B, H]
    wt: [H, H]   transform dense weight, stored [in, out] (torch weight.T)
    bt, gamma, beta: [H]
    wd: [H, V]   decoder weight, stored [in, out] (torch weight.T).  Pass it
                 already cast to `matmul_dtype` to avoid a per-call cast pass.
    bv: [V]      vocab bias
    wn: [H, 2]   seq_relationship weight, stored [in, out];   bn: [2]
    scores_dtype: dtype of prediction_scores (None -> sequence_output.dtype;
                  jnp.bfloat16 halves the R*V HBM write if the loss allows it).
    """
    B, S, H = sequence_output.shape
    V = wd.shape[1]
    n_cls = wn.shape[1]
    R = B * S
    out_dtype = sequence_output.dtype if scores_dtype is None else scores_dtype

    w_bpe = jnp.dtype(matmul_dtype).itemsize
    out_bpe = jnp.dtype(out_dtype).itemsize

    # ---------------- LM head (transform + decoder) ----------------
    tm_eff = min(_round_up(tm, 128), _round_up(R, 128))    # MXU-height row tile
    tv_eff = min(_round_up(tv, 128), _round_up(V, 128))    # lane-dense vocab tile

    # Generation-aware VMEM budget: 128 MiB on v5e/v6e, 64 MiB per TC on v7x.
    # Use ~75% of capacity as a ceiling and a fixed headroom for compiler
    # internal scratch / spills (no arbitrary 2x multiplier).
    vmem_cap = 64 << 20                       # conservative fallback (v7x)
    try:
        cap = getattr(pltpu.get_tpu_info(), "vmem_capacity_bytes", None)
        if cap:
            vmem_cap = int(cap)
    except Exception:
        pass
    vmem_ceiling = (vmem_cap * 3) // 4
    headroom = 12 << 20

    def _need(tm_, tv_):
        return (2 * tm_ * H * 4              # seq row tiles (f32, cast in-kernel)
                + 2 * H * H * w_bpe          # Wt (constant index; dbl-buffered)
                + 2 * 3 * H * 4              # bt / gamma / beta
                + 2 * H * tv_ * w_bpe        # decoder weight tiles
                + 2 * tv_ * 4                # vocab-bias tiles
                + 2 * tm_ * tv_ * out_bpe    # output tiles
                + tm_ * H * w_bpe)           # transform scratch
    # TODO(synk): single-buffer Wt/bt/gamma/beta via pipeline_mode=pl.Buffered(1)
    # to reclaim ~H*H*bpe of VMEM on versions where buffer_count=1 is supported.

    # Defensive shrink so the tiles always fit under the per-generation ceiling.
    while _need(tm_eff, tv_eff) + headroom > vmem_ceiling and tv_eff > 256:
        tv_eff = max(256, _round_up(tv_eff // 2, 128))
    while _need(tm_eff, tv_eff) + headroom > vmem_ceiling and tm_eff > 128:
        tm_eff = max(128, _round_up(tm_eff // 2, 128))
    vmem_limit = int(min(max(_need(tm_eff, tv_eff) + headroom, 32 << 20),
                         vmem_ceiling))

    # Rows: cheap explicit zero-pad (R*H) so the row grid has no remainder.
    R_pad = _round_up(R, tm_eff)
    seq2 = sequence_output.reshape(R, H)
    if R_pad != R:
        seq2 = jnp.pad(seq2, ((0, R_pad - R), (0, 0)))

    # Weight casts are no-ops if the caller already passes matmul_dtype.
    wt_c = wt if wt.dtype == matmul_dtype else wt.astype(matmul_dtype)
    wd_c = wd if wd.dtype == matmul_dtype else wd.astype(matmul_dtype)

    grid = (R_pad // tm_eff, pl.cdiv(V, tv_eff))

    scores = pl.pallas_call(
        functools.partial(mlm_head_kernel, eps=eps),
        out_shape=jax.ShapeDtypeStruct((R_pad, V), out_dtype),
        grid_spec=pltpu.PrefetchScalarGridSpec(
            num_scalar_prefetch=0,
            grid=grid,
            in_specs=[
                pl.BlockSpec((tm_eff, H), lambda i, j: (i, 0)),   # seq rows (f32)
                pl.BlockSpec((H, H), lambda i, j: (0, 0)),        # Wt (const)
                pl.BlockSpec((1, H), lambda i, j: (0, 0)),        # bt
                pl.BlockSpec((1, H), lambda i, j: (0, 0)),        # gamma
                pl.BlockSpec((1, H), lambda i, j: (0, 0)),        # beta
                pl.BlockSpec((H, tv_eff), lambda i, j: (0, j)),   # Wd tile (ragged ok)
                pl.BlockSpec((1, tv_eff), lambda i, j: (0, j)),   # vocab bias tile
            ],
            out_specs=pl.BlockSpec((tm_eff, tv_eff), lambda i, j: (i, j)),
            scratch_shapes=[pltpu.VMEM((tm_eff, H), matmul_dtype)],
        ),
        compiler_params=pltpu.CompilerParams(
            dimension_semantics=("parallel", "arbitrary"),
            vmem_limit_bytes=vmem_limit),
    )(seq2, wt_c, bt.reshape(1, H), gamma.reshape(1, H), beta.reshape(1, H),
      wd_c, bv.reshape(1, V))

    prediction_scores = scores[:R].reshape(B, S, V)

    # ---------------- NSP head (tiny 2-class linear) ----------------
    Bp = _round_up(B, 8)
    Np = _round_up(n_cls, 128)             # lane-dense, unmasked stores
    pooled_p = pooled_output
    if Bp != B:
        pooled_p = jnp.pad(pooled_p, ((0, Bp - B), (0, 0)))
    wn_p = jnp.pad(wn.astype(matmul_dtype), ((0, 0), (0, Np - n_cls)))
    bn_p = jnp.pad(bn, ((0, Np - n_cls),)).reshape(1, Np)

    nsp = pl.pallas_call(
        functools.partial(nsp_kernel, matmul_dtype=matmul_dtype),
        out_shape=jax.ShapeDtypeStruct((Bp, Np), pooled_output.dtype),
        in_specs=[pl.BlockSpec(memory_space=pltpu.MemorySpace.VMEM)] * 3,
        out_specs=pl.BlockSpec(memory_space=pltpu.MemorySpace.VMEM),
    )(pooled_p, wn_p, bn_p)

    seq_relationship_score = nsp[:B, :n_cls]
    return prediction_scores, seq_relationship_score


def reference(seq, pooled, wt, bt, gamma, beta, wd, bv, wn, bn, eps=1e-12):
    x = jnp.einsum("bsh,hk->bsk", seq, wt) + bt
    a = _gelu_tanh(x)
    mean = jnp.mean(a, axis=-1, keepdims=True)
    var = jnp.mean((a - mean) ** 2, axis=-1, keepdims=True)
    t = (a - mean) * lax.rsqrt(var + eps) * gamma + beta
    scores = jnp.einsum("bsh,hv->bsv", t, wd) + bv
    nsp = pooled @ wn + bn
    return scores, nsp


if __name__ == "__main__":
    # Small config: hidden_size=128, vocab_size=512, batch=2, seq=8, 2 classes.
    B, S, H, V = 2, 8, 128, 512
    eps = 1e-12

    key = jax.random.PRNGKey(0)
    ks = jax.random.split(key, 8)

    sequence_output = jax.random.normal(ks[0], (B, S, H), dtype=jnp.float32)
    pooled_output = jax.random.normal(ks[1], (B, H), dtype=jnp.float32)

    # Synthetic parameters; linear weights already stored [in, out] (torch W.T).
    wt = jax.random.normal(ks[2], (H, H), dtype=jnp.float32) * 0.02
    bt = jax.random.normal(ks[3], (H,), dtype=jnp.float32) * 0.02
    gamma = 1.0 + 0.1 * jax.random.normal(ks[4], (H,), dtype=jnp.float32)
    beta = 0.1 * jax.random.normal(ks[5], (H,), dtype=jnp.float32)
    wd = jax.random.normal(ks[6], (H, V), dtype=jnp.float32) * 0.02
    bv = jnp.zeros((V,), dtype=jnp.float32)          # decoder bias (zeros init)
    wn = jax.random.normal(ks[7], (H, 2), dtype=jnp.float32) * 0.02
    bn = jnp.zeros((2,), dtype=jnp.float32)

    # Pre-cast the (large) matmul weights ONCE outside the step, per the perf
    # review: the in-function .astype is then a no-op.
    mm_dtype = jnp.bfloat16
    wt_b = wt.astype(mm_dtype)
    wd_b = wd.astype(mm_dtype)

    scores, nsp = bert_pretraining_heads(
        sequence_output, pooled_output, wt_b, bt, gamma, beta, wd_b, bv, wn, bn,
        eps=eps, matmul_dtype=mm_dtype)
    scores, nsp = jax.block_until_ready((scores, nsp))

    ref_scores, ref_nsp = reference(sequence_output, pooled_output, wt, bt,
                                    gamma, beta, wd, bv, wn, bn, eps)

    assert scores.shape == (B, S, V)
    assert nsp.shape == (B, 2)
    # bf16 matmul operands (f32 accumulation) vs pure-f32 reference.
    assert jnp.allclose(scores, ref_scores, atol=5e-2, rtol=5e-2)
    assert jnp.allclose(nsp, ref_nsp, atol=2e-2, rtol=2e-2)

    print("KERNEL_OK")
</pallas_src>

<mosaic_0001>
module attributes {stable_mosaic.version = 11 : i64} {
  func.func @mlm_head_kernel(%arg0: i32, %arg1: i32, %arg2: memref<128x128xf32, #tpu.memory_space<vmem>>, %arg3: memref<128x128xbf16, #tpu.memory_space<vmem>>, %arg4: memref<1x128xf32, #tpu.memory_space<vmem>>, %arg5: memref<1x128xf32, #tpu.memory_space<vmem>>, %arg6: memref<1x128xf32, #tpu.memory_space<vmem>>, %arg7: memref<128x512xbf16, #tpu.memory_space<vmem>>, %arg8: memref<1x512xf32, #tpu.memory_space<vmem>>, %arg9: memref<128x512xf32, #tpu.memory_space<vmem>>, %arg10: memref<128x128xbf16, #tpu.memory_space<vmem>>) attributes {dimension_semantics = [#tpu.dimension_semantics<parallel>, #tpu.dimension_semantics<arbitrary>], iteration_bounds = array<i64: 1, 1>, scalar_prefetch = 0 : i64, scratch_operands = 1 : i64, tpu.core_type = #tpu.core_type<tc>, window_params = [{transform_indices = @transform_0, window_bounds = array<i64: 128, 128>}, {pipeline_mode = #tpu.pipeline_mode<synchronous>, transform_indices = @transform_1, window_bounds = array<i64: 128, 128>}, {pipeline_mode = #tpu.pipeline_mode<synchronous>, transform_indices = @transform_2, window_bounds = array<i64: 1, 128>}, {pipeline_mode = #tpu.pipeline_mode<synchronous>, transform_indices = @transform_3, window_bounds = array<i64: 1, 128>}, {pipeline_mode = #tpu.pipeline_mode<synchronous>, transform_indices = @transform_4, window_bounds = array<i64: 1, 128>}, {transform_indices = @transform_5, window_bounds = array<i64: 128, 512>}, {transform_indices = @transform_6, window_bounds = array<i64: 1, 512>}, {transform_indices = @transform_7, window_bounds = array<i64: 128, 512>}]} {
    %c0_i32 = arith.constant 0 : i32
    %0 = arith.cmpi eq, %arg1, %c0_i32 : i32
    %1 = arith.extui %0 : i1 to i32
    %c0_i32_0 = arith.constant 0 : i32
    %2 = arith.cmpi ne, %1, %c0_i32_0 : i32
    scf.if %2 {
      %c0_8 = arith.constant 0 : index
      %c0_9 = arith.constant 0 : index
      %10 = vector.load %arg2[%c0_8, %c0_9] : memref<128x128xf32, #tpu.memory_space<vmem>>, vector<128x128xf32>
      %11 = arith.truncf %10 : vector<128x128xf32> to vector<128x128xbf16>
      %c0_10 = arith.constant 0 : index
      %c0_11 = arith.constant 0 : index
      %12 = vector.load %arg3[%c0_10, %c0_11] : memref<128x128xbf16, #tpu.memory_space<vmem>>, vector<128x128xbf16>
      %cst_12 = arith.constant dense<0.000000e+00> : vector<128x128xf32>
      %13 = tpu.matmul %11, %12, %cst_12 {dimension_numbers = #tpu.dot_dimension_numbers<[1], [0], [0], [1], [0, 0, 1, 1], [], []>} : vector<128x128xbf16>, vector<128x128xbf16>, vector<128x128xf32> -> vector<128x128xf32>
      %c0_13 = arith.constant 0 : index
      %c0_14 = arith.constant 0 : index
      %14 = vector.load %arg4[%c0_13, %c0_14] : memref<1x128xf32, #tpu.memory_space<vmem>>, vector<1x128xf32>
      %15 = vector.broadcast %14 : vector<1x128xf32> to vector<128x128xf32>
      %16 = arith.addf %13, %15 : vector<128x128xf32>
      %cst_15 = arith.constant 5.000000e-01 : f32
      %17 = vector.broadcast %cst_15 : f32 to vector<128x128xf32>
      %18 = arith.mulf %17, %16 : vector<128x128xf32>
      %cst_16 = arith.constant 4.471500e-02 : f32
      %19 = vector.broadcast %cst_16 : f32 to vector<128x128xf32>
      %20 = arith.mulf %19, %16 : vector<128x128xf32>
      %21 = arith.mulf %20, %16 : vector<128x128xf32>
      %22 = arith.mulf %21, %16 : vector<128x128xf32>
      %23 = arith.addf %16, %22 : vector<128x128xf32>
      %cst_17 = arith.constant 0.797884583 : f32
      %24 = vector.broadcast %cst_17 : f32 to vector<128x128xf32>
      %25 = arith.mulf %24, %23 : vector<128x128xf32>
      %26 = math.tanh %25 : vector<128x128xf32>
      %cst_18 = arith.constant 1.000000e+00 : f32
      %27 = vector.broadcast %cst_18 : f32 to vector<128x128xf32>
      %28 = arith.addf %27, %26 : vector<128x128xf32>
      %29 = arith.mulf %18, %28 : vector<128x128xf32>
      %cst_19 = arith.constant dense<0.000000e+00> : vector<128xf32>
      %30 = vector.multi_reduction <add>, %29, %cst_19 [1] : vector<128x128xf32> to vector<128xf32>
      %31 = vector.shape_cast %30 : vector<128xf32> to vector<128x1xf32>
      %cst_20 = arith.constant 1.280000e+02 : f32
      %32 = vector.broadcast %cst_20 : f32 to vector<128x1xf32>
      %33 = arith.divf %31, %32 : vector<128x1xf32>
      %34 = vector.broadcast %33 : vector<128x1xf32> to vector<128x128xf32>
      %35 = arith.subf %29, %34 : vector<128x128xf32>
      %36 = arith.mulf %35, %35 : vector<128x128xf32>
      %cst_21 = arith.constant dense<0.000000e+00> : vector<128xf32>
      %37 = vector.multi_reduction <add>, %36, %cst_21 [1] : vector<128x128xf32> to vector<128xf32>
      %38 = vector.shape_cast %37 : vector<128xf32> to vector<128x1xf32>
      %cst_22 = arith.constant 1.280000e+02 : f32
      %39 = vector.broadcast %cst_22 : f32 to vector<128x1xf32>
      %40 = arith.divf %38, %39 : vector<128x1xf32>
      %c0_23 = arith.constant 0 : index
      %c0_24 = arith.constant 0 : index
      %41 = vector.load %arg5[%c0_23, %c0_24] : memref<1x128xf32, #tpu.memory_space<vmem>>, vector<1x128xf32>
      %cst_25 = arith.constant 9.99999996E-13 : f32
      %42 = vector.broadcast %cst_25 : f32 to vector<128x1xf32>
      %43 = arith.addf %40, %42 : vector<128x1xf32>
      %44 = math.rsqrt %43 : vector<128x1xf32>
      %45 = vector.broadcast %41 : vector<1x128xf32> to vector<128x128xf32>
      %46 = vector.broadcast %44 : vector<128x1xf32> to vector<128x128xf32>
      %47 = arith.mulf %45, %46 : vector<128x128xf32>
      %48 = arith.mulf %35, %47 : vector<128x128xf32>
      %c0_26 = arith.constant 0 : index
      %c0_27 = arith.constant 0 : index
      %49 = vector.load %arg6[%c0_26, %c0_27] : memref<1x128xf32, #tpu.memory_space<vmem>>, vector<1x128xf32>
      %50 = vector.broadcast %49 : vector<1x128xf32> to vector<128x128xf32>
      %51 = arith.addf %48, %50 : vector<128x128xf32>
      %52 = arith.truncf %51 : vector<128x128xf32> to vector<128x128xbf16>
      %c0_28 = arith.constant 0 : index
      %c0_29 = arith.constant 0 : index
      %53 = vector.load %arg10[%c0_28, %c0_29] : memref<128x128xbf16, #tpu.memory_space<vmem>>, vector<128x128xbf16>
      tpu.vector_store %arg10[%c0_28, %c0_29], %52 {strides = array<i32>} : memref<128x128xbf16, #tpu.memory_space<vmem>>, vector<128x128xbf16>,
    } else {
    }
    %c0 = arith.constant 0 : index
    %c0_1 = arith.constant 0 : index
    %3 = vector.load %arg10[%c0, %c0_1] : memref<128x128xbf16, #tpu.memory_space<vmem>>, vector<128x128xbf16>
    %c0_2 = arith.constant 0 : index
    %c0_3 = arith.constant 0 : index
    %4 = vector.load %arg7[%c0_2, %c0_3] : memref<128x512xbf16, #tpu.memory_space<vmem>>, vector<128x512xbf16>
    %cst = arith.constant dense<0.000000e+00> : vector<128x512xf32>
    %5 = tpu.matmul %3, %4, %cst {dimension_numbers = #tpu.dot_dimension_numbers<[1], [0], [0], [1], [0, 0, 1, 1], [], []>} : vector<128x128xbf16>, vector<128x512xbf16>, vector<128x512xf32> -> vector<128x512xf32>
    %c0_4 = arith.constant 0 : index
    %c0_5 = arith.constant 0 : index
    %6 = vector.load %arg8[%c0_4, %c0_5] : memref<1x512xf32, #tpu.memory_space<vmem>>, vector<1x512xf32>
    %7 = vector.broadcast %6 : vector<1x512xf32> to vector<128x512xf32>
    %8 = arith.addf %5, %7 : vector<128x512xf32>
    %c0_6 = arith.constant 0 : index
    %c0_7 = arith.constant 0 : index
    %9 = vector.load %arg9[%c0_6, %c0_7] : memref<128x512xf32, #tpu.memory_space<vmem>>, vector<128x512xf32>
    tpu.vector_store %arg9[%c0_6, %c0_7], %8 {strides = array<i32>} : memref<128x512xf32, #tpu.memory_space<vmem>>, vector<128x512xf32>,
    return
  }
  func.func @transform_0(%arg0: i32, %arg1: i32) -> (i32, i32) {
    %c0_i32 = arith.constant 0 : i32
    %c0_i32_0 = arith.constant 0 : i32
    return %arg0, %c0_i32 : i32, i32
  }
  func.func @transform_1(%arg0: i32, %arg1: i32) -> (i32, i32) {
    %c0_i32 = arith.constant 0 : i32
    %c0_i32_0 = arith.constant 0 : i32
    %c0_i32_1 = arith.constant 0 : i32
    return %c0_i32, %c0_i32_0 : i32, i32
  }
  func.func @transform_2(%arg0: i32, %arg1: i32) -> (i32, i32) {
    %c0_i32 = arith.constant 0 : i32
    %c0_i32_0 = arith.constant 0 : i32
    %c0_i32_1 = arith.constant 0 : i32
    return %c0_i32, %c0_i32_0 : i32, i32
  }
  func.func @transform_3(%arg0: i32, %arg1: i32) -> (i32, i32) {
    %c0_i32 = arith.constant 0 : i32
    %c0_i32_0 = arith.constant 0 : i32
    %c0_i32_1 = arith.constant 0 : i32
    return %c0_i32, %c0_i32_0 : i32, i32
  }
  func.func @transform_4(%arg0: i32, %arg1: i32) -> (i32, i32) {
    %c0_i32 = arith.constant 0 : i32
    %c0_i32_0 = arith.constant 0 : i32
    %c0_i32_1 = arith.constant 0 : i32
    return %c0_i32, %c0_i32_0 : i32, i32
  }
  func.func @transform_5(%arg0: i32, %arg1: i32) -> (i32, i32) {
    %c0_i32 = arith.constant 0 : i32
    %c0_i32_0 = arith.constant 0 : i32
    return %c0_i32, %arg1 : i32, i32
  }
  func.func @transform_6(%arg0: i32, %arg1: i32) -> (i32, i32) {
    %c0_i32 = arith.constant 0 : i32
    %c0_i32_0 = arith.constant 0 : i32
    return %c0_i32, %arg1 : i32, i32
  }
  func.func @transform_7(%arg0: i32, %arg1: i32) -> (i32, i32) {
    %c0_i32 = arith.constant 0 : i32
    return %arg0, %arg1 : i32, i32
  }
}

</mosaic_0001>

<bundles_post_ra>
// kernel: tpu_custom_call.1
= control target key start
LH: loop header
LB: loop body
LE: loop exit
PB: predicated region body
PF: predicated region fallthrough
CT: control target
= control target key end

     0   :  { %12 = vsyncpa [#allocation4], 0  ;;  %s2396_s0 = inlined_call_operand.hbm [shape: f32[128,128], index: 0, kind: input, shape index: {}]   ;;  %s2397_s1 = inlined_call_operand.hbm [shape: bf16[128,128], index: 1, kind: input, shape index: {}]   ;;  %s2398_s2 = inlined_call_operand.vmem [shape: f32[1,128], index: 2, kind: input, shape index: {}]   ;;  %s2399_s3 = inlined_call_operand.hbm [shape: f32[1,128], index: 3, kind: input, shape index: {}]   ;;  %s2400_s4 = inlined_call_operand.hbm [shape: f32[1,128], index: 4, kind: input, shape index: {}]   ;;  %s2401_s5 = inlined_call_operand.hbm [shape: bf16[128,512], index: 5, kind: input, shape index: {}]   ;;  %s2402_s6 = inlined_call_operand.vmem [shape: f32[1,512], index: 6, kind: input, shape index: {}]   ;;  %s2403_s7 = inlined_call_operand.hbm [shape: f32[128,512], index: 7, kind: output, shape index: {}]  }
   0x1   :  { %13 = vsyncpa [#allocation7], 0 }
   0x2   :  { %14 = vsyncpa [#allocation10], 0  ;;  %s33_s26 = sshll.u32 %s2397_s1, 4  ;;  %s34_s26 = int_to_ptr.hbm [resolvable:$true] %s33_s26 }
   0x3   :  { %15 = vsyncpa [#allocation5], 0  ;;  %s1883_s27 = smov [#allocation6]   ;;  %s60_s8 = sshll.u32 %s2400_s4, 4  ;;  %s61_s8 = int_to_ptr.hbm [resolvable:$true] %s60_s8 }
   0x4   :  { %s35_s28 = sshll.u32 %s1883_s27, 4  ;;  %s1884_s9 = smov 64   ;;  %s36_s28 = int_to_ptr.vmem [resolvable:$true] %s35_s28 }
   0x5   :  { %s1885_s10 = smov 4   ;;  %s1886_s11 = smov [#allocation9]  }
   0x6   :  { %41 = dma.hbm_to_vmem [thread:$0]  %s34_s26, 1024, %s36_s28, [#allocation7], %s1884_s9, %s1884_s9, %s1885_s10  }
   0x7   :  { %s62_s12 = sshll.u32 %s1886_s11, 4  ;;  %s20_s15 = sshll.u32 %s2396_s0, 4  ;;  %s63_s12 = int_to_ptr.vmem [resolvable:$true] %s62_s12  ;;  %s21_s15 = int_to_ptr.hbm [resolvable:$true] %s20_s15 }
   0x8   :  { %65 = dma.hbm_to_vmem [thread:$0]  %s61_s8, 16, %s63_s12, [#allocation10]  }
   0x9   :  { %s1887_s1 = smov [#allocation3]   ;;  %s49_s4 = sshll.u32 %s2399_s3, 4  ;;  %s50_s4 = int_to_ptr.hbm [resolvable:$true] %s49_s4 }
   0xa   :  { %s22_s16 = sshll.u32 %s1887_s1, 4  ;;  %s1888_s19 = smov 128   ;;  %s23_s16 = int_to_ptr.vmem [resolvable:$true] %s22_s16 }
   0xb   :  { %s1889_s20 = smov 8   ;;  %s1890_s21 = smov [#allocation8]  }
   0xc   :  { %28 = dma.hbm_to_vmem [thread:$0]  %s21_s15, 2048, %s23_s16, [#allocation4], %s1888_s19, %s1888_s19, %s1889_s20  }
   0xd   :  { %s51_s22 = sshll.u32 %s1890_s21, 4  ;;  %s70_s0 = sshll.u32 %s2401_s5, 4  ;;  %s52_s22 = int_to_ptr.vmem [resolvable:$true] %s51_s22  ;;  %s71_s0 = int_to_ptr.hbm [resolvable:$true] %s70_s0 }
   0xe   :  { %54 = dma.hbm_to_vmem [thread:$0]  %s50_s4, 16, %s52_s22, [#allocation7]  }
   0xf   :  { %s1891_s25 = smov [#allocation11]   ;;  %s1892_s27 = smov 256  }
  0x10   :  { %s72_s26 = sshll.u32 %s1891_s25, 4  ;;  %s1893_s28 = smov 16   ;;  %s73_s26 = int_to_ptr.vmem [resolvable:$true] %s72_s26 }
  0x11   :  { %78 = dma.hbm_to_vmem [thread:$0]  %s71_s0, 4096, %s73_s26, [#allocation10], %s1892_s27, %s1892_s27, %s1893_s28  }
  0x12   :  { %1875 = dma.done.wait [#allocation4], 2048  }
  0x13   :  { %1876 = vsyncadd [#allocation4], 4294965248 }
  0x14   :  { %1877 = dma.done.wait [#allocation7], 1040  }
  0x15   :  { %1878 = vsyncadd [#allocation7], 4294966256 }
  0x16   :  { %1879 = dma.done.wait [#allocation10], 4112  }
  0x17   :  { %1880 = vsyncadd [#allocation10], 4294963184  ;;  %v1535_v0 = vld [vmem:[#allocation6 + $0x38] sm:$0xff]  ;;  %v1534_v1 = vld [vmem:[#allocation6 + $0x30] sm:$0xff]  ;;  %s1321_s10 = sshll.u32 %s2403_s7, 4  ;;  %s1896_s11 = smov 512   ;;  %s1322_s10 = int_to_ptr.hbm [resolvable:$true] %s1321_s10 }
  0x18   :  { %197 = vmatpush.bf16.msra.mxu0 %v1535_v0  ;;  %1623 = vmatpush.bf16.msra.mxu1 %v1535_v0  ;;  %v1533_v2 = vld [vmem:[#allocation6 + $0x28] sm:$0xff]  ;;  %v1532_v3 = vld [vmem:[#allocation6 + $0x20] sm:$0xff]  ;;  %v1531_v4 = vld [vmem:[#allocation6 + $0x18] sm:$0xff]  ;;  %s1897_s12 = smov 32  }
  0x19   :  { %1624 = vmatpush.bf16.msra.mxu2 %v1535_v0  ;;  %1625 = vmatpush.bf16.msra.mxu3 %v1535_v0  ;;  %v1530_v5 = vld [vmem:[#allocation6 + $0x10] sm:$0xff]  ;;  %v1529_v6 = vld [vmem:[#allocation6 + $0x8] sm:$0xff]  ;;  %v1528_v7 = vld [vmem:[#allocation6] sm:$0xff] }
  0x1a   :  { %v105_v8 = vld [vmem:[#allocation3] sm:$0xff]  ;;  %v106_v9 = vld [vmem:[#allocation3 + $0x8] sm:$0xff]  ;;  %v107_v17 = vld [vmem:[#allocation3 + $0x10] sm:$0xff] }
  0x1b   :  { %v109_v10 = vld [vmem:[#allocation3 + $0x20] sm:$0xff]  ;;  %v110_v11 = vld [vmem:[#allocation3 + $0x28] sm:$0xff]  ;;  %v121_v14 = vpack.c.bf16 %v106_v9, %v105_v8  ;;  %v108_v18 = vld [vmem:[#allocation3 + $0x18] sm:$0xff] }
  0x1c   :  { %198 = vmatpush.bf16.msra.mxu0 %v1534_v1  ;;  %1626 = vmatpush.bf16.msra.mxu1 %v1534_v1  ;;  %v113_v12 = vld [vmem:[#allocation3 + $0x40] sm:$0xff]  ;;  %v114_v13 = vld [vmem:[#allocation3 + $0x48] sm:$0xff]  ;;  %v123_v15 = vpack.c.bf16 %v110_v11, %v109_v10  ;;  %v111_v19 = vld [vmem:[#allocation3 + $0x30] sm:$0xff]  ;;  %v122_v21 = vpack.c.bf16 %v108_v18, %v107_v17 }
  0x1d   :  { %1627 = vmatpush.bf16.msra.mxu2 %v1534_v1  ;;  %1628 = vmatpush.bf16.msra.mxu3 %v1534_v1  ;;  %v125_v16 = vpack.c.bf16 %v114_v13, %v113_v12  ;;  %v112_v20 = vld [vmem:[#allocation3 + $0x38] sm:$0xff]  ;;  %v115_v23 = vld [vmem:[#allocation3 + $0x50] sm:$0xff]  ;;  %v117_v25 = vld [vmem:[#allocation3 + $0x60] sm:$0xff] }
  0x1e   :  { %v124_v22 = vpack.c.bf16 %v112_v20, %v111_v19  ;;  %v116_v24 = vld [vmem:[#allocation3 + $0x58] sm:$0xff]  ;;  %v118_v27 = vld [vmem:[#allocation3 + $0x68] sm:$0xff]  ;;  %v1956_v29 = vld [vmem:[%s2398_s2] ss:$0 sm:$0xff] }
  0x1f   :  { %v126_v26 = vpack.c.bf16 %v116_v24, %v115_v23  ;;  %v127_v28 = vpack.c.bf16 %v118_v27, %v117_v25  ;;  %v119_v34 = vld [vmem:[#allocation3 + $0x70] sm:$0xff]  ;;  %v120_v35 = vld [vmem:[#allocation3 + $0x78] sm:$0xff] }
  0x20   :  { %199 = vmatpush.bf16.msra.mxu0 %v1533_v2  ;;  %1629 = vmatpush.bf16.msra.mxu1 %v1533_v2  ;;  %v128_v38 = vpack.c.bf16 %v120_v35, %v119_v34 }
  0x21   :  { %1630 = vmatpush.bf16.msra.mxu2 %v1533_v2  ;;  %1631 = vmatpush.bf16.msra.mxu3 %v1533_v2 }
  0x24   :  { %200 = vmatpush.bf16.msra.mxu0 %v1532_v3  ;;  %1632 = vmatpush.bf16.msra.mxu1 %v1532_v3 }
  0x25   :  { %1633 = vmatpush.bf16.msra.mxu2 %v1532_v3  ;;  %1634 = vmatpush.bf16.msra.mxu3 %v1532_v3 }
  0x28   :  { %201 = vmatpush.bf16.msra.mxu0 %v1531_v4  ;;  %1635 = vmatpush.bf16.msra.mxu1 %v1531_v4 }
  0x29   :  { %1636 = vmatpush.bf16.msra.mxu2 %v1531_v4  ;;  %1637 = vmatpush.bf16.msra.mxu3 %v1531_v4 }
  0x2c   :  { %202 = vmatpush.bf16.msra.mxu0 %v1530_v5  ;;  %1638 = vmatpush.bf16.msra.mxu1 %v1530_v5 }
  0x2d   :  { %1639 = vmatpush.bf16.msra.mxu2 %v1530_v5  ;;  %1640 = vmatpush.bf16.msra.mxu3 %v1530_v5 }
  0x30   :  { %203 = vmatpush.bf16.msra.mxu0 %v1529_v6  ;;  %1641 = vmatpush.bf16.msra.mxu1 %v1529_v6 }
  0x31   :  { %1642 = vmatpush.bf16.msra.mxu2 %v1529_v6  ;;  %1643 = vmatpush.bf16.msra.mxu3 %v1529_v6 }
  0x34   :  { %204 = vmatpush.bf16.msra.mxu0 %v1528_v7  ;;  %1644 = vmatpush.bf16.msra.mxu1 %v1528_v7 }
  0x35   :  { %1645 = vmatpush.bf16.msra.mxu2 %v1528_v7  ;;  %1646 = vmatpush.bf16.msra.mxu3 %v1528_v7 }
  0x37   :  { %205 = vmatmul.bf16.vlgmr.msra.gmra.mxu0 %v121_v14  ;;  %215 = vmatmul.bf16.vlgmr.msra.gmra.mxu1 %v123_v15 }
  0x38   :  { %225 = vmatmul.bf16.vlgmr.msra.gmra.mxu2 %v125_v16  ;;  %235 = vmatmul.bf16.vlgmr.msra.gmra.mxu3 %v127_v28 }
  0x47   :  { %210 = vmatmul.bf16.gmra.mxu0 %v122_v21  ;;  %220 = vmatmul.bf16.gmra.mxu1 %v124_v22 }
  0x48   :  { %230 = vmatmul.bf16.gmra.mxu2 %v126_v26  ;;  %240 = vmatmul.bf16.gmra.mxu3 %v128_v38 }
  0xb4   :  { %v206_v30 = vpop.f32.mrf.mxu0  ;;  %v216_v31 = vpop.f32.mrf.mxu1 }
  0xb5   :  { %v207_v32 = vadd.f32 %v1956_v29, %v206_v30  ;;  %v217_v33 = vadd.f32 %v1956_v29, %v216_v31 }
  0xb7   :  { %v266_v36 = vmul.f32 0.044715, %v217_v33  ;;  %v262_v37 = vmul.f32 0.044715, %v207_v32  ;;  %v250_v61 = vmul.f32 0.5, %v217_v33  ;;  %v246_v7 = vmul.f32 0.5, %v207_v32 }
  0xb9   :  { %v282_v39 = vmul.f32 %v266_v36, %v217_v33  ;;  %v278_v40 = vmul.f32 %v262_v37, %v207_v32 }
  0xbb   :  { %v298_v41 = vmul.f32 %v282_v39, %v217_v33  ;;  %v294_v42 = vmul.f32 %v278_v40, %v207_v32 }
  0xbc   :  { %v208_v43 = vpop.f32.mrf.mxu0  ;;  %v218_v44 = vpop.f32.mrf.mxu1 }
  0xbd   :  { %v209_v45 = vadd.f32 %v1956_v29, %v208_v43  ;;  %v219_v46 = vadd.f32 %v1956_v29, %v218_v44  ;;  %v314_v47 = vadd.f32 %v298_v41, %v217_v33  ;;  %v310_v48 = vadd.f32 %v294_v42, %v207_v32 }
  0xbf   :  { %v330_v49 = vmul.f32 0.7978846, %v314_v47  ;;  %v326_v50 = vmul.f32 0.7978846, %v310_v48  ;;  %v267_v51 = vmul.f32 0.044715, %v219_v46  ;;  %v226_v48 = vpop.f32.mrf.mxu2 }
  0xc0   :  { %v263_v52 = vmul.f32 0.044715, %v209_v45  ;;  %v251_v19 = vmul.f32 0.5, %v219_v46  ;;  %v247_v26 = vmul.f32 0.5, %v209_v45 }
  0xc1   :  { %1665 = vtanh.f32 %v330_v49  ;;  %v283_v53 = vmul.f32 %v267_v51, %v219_v46  ;;  %v1894_v49 = vmov 128.0  }
  0xc2   :  { %1667 = vtanh.f32 %v326_v50  ;;  %v279_v54 = vmul.f32 %v263_v52, %v209_v45 }
  0xc3   :  { %v299_v57 = vmul.f32 %v283_v53, %v219_v46 }
  0xc4   :  { %v211_v55 = vpop.f32.mrf.mxu0  ;;  %v221_v56 = vpop.f32.mrf.mxu1  ;;  %v295_v58 = vmul.f32 %v279_v54, %v209_v45 }
  0xc5   :  { %v212_v59 = vadd.f32 %v1956_v29, %v211_v55  ;;  %v222_v60 = vadd.f32 %v1956_v29, %v221_v56  ;;  %v315_v62 = vadd.f32 %v299_v57, %v219_v46  ;;  %v1988_v55 = vadd.f32 %v1956_v29, %v226_v48 }
  0xc6   :  { %v311_v63 = vadd.f32 %v295_v58, %v209_v45 }
  0xc7   :  { %v1666_v0 = vpop.eup %1665  ;;  %v268_v1 = vmul.f32 0.044715, %v222_v60  ;;  %v264_v2 = vmul.f32 0.044715, %v212_v59  ;;  %v331_v5 = vmul.f32 0.7978846, %v315_v62  ;;  %v228_v54 = vpop.f32.mrf.mxu2 }
  0xc8   :  { %v1668_v3 = vpop.eup %1667  ;;  %v362_v4 = vadd.f32 1.0, %v1666_v0  ;;  %v327_v6 = vmul.f32 0.7978846, %v311_v63  ;;  %v252_v33 = vmul.f32 0.5, %v222_v60  ;;  %v248_v36 = vmul.f32 0.5, %v212_v59  ;;  %v236_v62 = vpop.f32.mrf.mxu3 }
  0xc9   :  { %v358_v8 = vadd.f32 1.0, %v1668_v3  ;;  %v284_v9 = vmul.f32 %v268_v1, %v222_v60  ;;  %v280_v10 = vmul.f32 %v264_v2, %v212_v59  ;;  %1669 = vtanh.f32 %v331_v5 }
  0xca   :  { %v1964_v11 = vmul.f32 %v362_v4, %v250_v61  ;;  %1671 = vtanh.f32 %v327_v6  ;;  %v1992_v63 = vadd.f32 %v1956_v29, %v228_v54 }
  0xcb   :  { %v1966_v12 = vmul.f32 %v358_v8, %v246_v7  ;;  %v300_v13 = vmul.f32 %v284_v9, %v222_v60  ;;  %v296_v14 = vmul.f32 %v280_v10, %v212_v59 }
  0xcc   :  { %398 = vadd.xlane.f32.xlu2 %v1964_v11  ;;  %v213_v15 = vpop.f32.mrf.mxu0  ;;  %v223_v47 = vpop.f32.mrf.mxu1  ;;  %v271_v5 = vmul.f32 0.044715, %v1992_v63 }
  0xcd   :  { %v214_v16 = vadd.f32 %v1956_v29, %v213_v15  ;;  %390 = vadd.xlane.f32.xlu0 %v1966_v12  ;;  %v316_v17 = vadd.f32 %v300_v13, %v222_v60  ;;  %v312_v18 = vadd.f32 %v296_v14, %v212_v59  ;;  %v224_v50 = vadd.f32 %v1956_v29, %v223_v47 }
  0xce   :  { %v270_v59 = vmul.f32 0.044715, %v1988_v55  ;;  %v287_v10 = vmul.f32 %v271_v5, %v1992_v63 }
  0xcf   :  { %v332_v20 = vmul.f32 0.7978846, %v316_v17  ;;  %v328_v21 = vmul.f32 0.7978846, %v312_v18  ;;  %v1670_v22 = vpop.eup %1669  ;;  %v265_v23 = vmul.f32 0.044715, %v214_v16  ;;  %v231_v61 = vpop.f32.mrf.mxu2 }
  0xd0   :  { %v1672_v24 = vpop.eup %1671  ;;  %v363_v25 = vadd.f32 1.0, %v1670_v22  ;;  %v249_v43 = vmul.f32 0.5, %v214_v16  ;;  %v269_v52 = vmul.f32 0.044715, %v224_v50  ;;  %v286_v1 = vmul.f32 %v270_v59, %v1988_v55  ;;  %v238_v15 = vpop.f32.mrf.mxu3 }
  0xd1   :  { %1673 = vtanh.f32 %v332_v20  ;;  %v359_v27 = vadd.f32 1.0, %v1672_v24  ;;  %v281_v28 = vmul.f32 %v265_v23, %v214_v16  ;;  %v2000_v7 = vadd.f32 %v1956_v29, %v231_v61 }
  0xd2   :  { %1675 = vtanh.f32 %v328_v21  ;;  %v1971_v30 = vmul.f32 %v363_v25, %v251_v19  ;;  %v285_v56 = vmul.f32 %v269_v52, %v224_v50  ;;  %v302_v4 = vmul.f32 %v286_v1, %v1988_v55 }
  0xd3   :  { %v1973_v31 = vmul.f32 %v359_v27, %v247_v26  ;;  %v297_v32 = vmul.f32 %v281_v28, %v214_v16  ;;  %v272_v17 = vmul.f32 0.044715, %v2000_v7  ;;  %v303_v20 = vmul.f32 %v287_v10, %v1992_v63 }
  0xd4   :  { %400 = vadd.xlane.f32.xlu2 %v1971_v30  ;;  %v301_v58 = vmul.f32 %v285_v56, %v224_v50  ;;  %v318_v9 = vadd.f32 %v302_v4, %v1988_v55  ;;  %v2016_v24 = vadd.f32 %v1956_v29, %v238_v15  ;;  %v253_v28 = vmul.f32 0.5, %v224_v50 }
  0xd5   :  { %392 = vadd.xlane.f32.xlu0 %v1973_v31  ;;  %v313_v34 = vadd.f32 %v297_v32, %v214_v16  ;;  %v319_v25 = vadd.f32 %v303_v20, %v1992_v63 }
  0xd6   :  { %v317_v0 = vadd.f32 %v301_v58, %v224_v50  ;;  %v334_v19 = vmul.f32 0.7978846, %v318_v9 }
  0xd7   :  { %v1674_v35 = vpop.eup %1673  ;;  %v329_v39 = vmul.f32 0.7978846, %v313_v34  ;;  %v233_v14 = vpop.f32.mrf.mxu2  ;;  %v275_v34 = vmul.f32 0.044715, %v2016_v24 }
  0xd8   :  { %v1676_v37 = vpop.eup %1675  ;;  %v364_v38 = vadd.f32 1.0, %v1674_v35  ;;  %v333_v3 = vmul.f32 0.7978846, %v317_v0  ;;  %v2010_v18 = vadd.f32 %v1956_v29, %v233_v14  ;;  %v241_v35 = vpop.f32.mrf.mxu3  ;;  %v255_v14 = vmul.f32 0.5, %v1992_v63 }
  0xd9   :  { %v360_v40 = vadd.f32 1.0, %v1676_v37  ;;  %1677 = vtanh.f32 %v329_v39  ;;  %v2036_v47 = vadd.f32 %v1956_v29, %v241_v35  ;;  %v291_v48 = vmul.f32 %v275_v34, %v2016_v24 }
  0xda   :  { %v1977_v41 = vmul.f32 %v364_v38, %v252_v33  ;;  %1679 = vrcp.f32 %v1894_v49  ;;  %v273_v26 = vmul.f32 0.044715, %v2010_v18  ;;  %v335_v38 = vmul.f32 0.7978846, %v319_v25 }
  0xdb   :  { %v1979_v42 = vmul.f32 %v360_v40, %v248_v36  ;;  %1681 = vtanh.f32 %v333_v3  ;;  %v2029_v40 = vadd.f32 %v1956_v29, %v236_v62  ;;  %v276_v58 = vmul.f32 0.044715, %v2036_v47 }
  0xdc   :  { %402 = vadd.xlane.f32.xlu2 %v1977_v41  ;;  %1683 = vtanh.f32 %v334_v19  ;;  %v289_v39 = vmul.f32 %v273_v26, %v2010_v18 }
  0xdd   :  { %394 = vadd.xlane.f32.xlu1 %v1979_v42  ;;  %1685 = vtanh.f32 %v335_v38  ;;  %v274_v56 = vmul.f32 0.044715, %v2029_v40  ;;  %v292_v4 = vmul.f32 %v276_v58, %v2036_v47  ;;  %v1572_v58 = vld [vmem:[#allocation11 + $0xe4] sm:$0xf] }
  0xdf   :  { %v1678_v44 = vpop.eup %1677  ;;  %v290_v1 = vmul.f32 %v274_v56, %v2029_v40  ;;  %v308_v19 = vmul.f32 %v292_v4, %v2036_v47  ;;  %v1514_v56 = vld [vmem:[#allocation11 + $0xe0] sm:$0xf] }
  0xe0   :  { %v361_v45 = vadd.f32 1.0, %v1678_v44  ;;  %v1680_v51 = vpop.eup %1679  ;;  %v243_v4 = vpop.f32.mrf.mxu3 }
  0xe1   :  { %v423_v53 = vmul.f32 128.0, %v1680_v51  ;;  %vm427_vm0 = vweird.f32 %v1680_v51  ;;  %v1682_v22 = vpop.eup %1681  ;;  %v306_v10 = vmul.f32 %v290_v1, %v2029_v40 }
  0xe2   :  { %v1983_v46 = vmul.f32 %v361_v45, %v249_v43  ;;  %v365_v32 = vadd.f32 1.0, %v1682_v22  ;;  %v1684_v44 = vpop.eup %1683 }
  0xe3   :  { %v424_v57 = vsub.f32 1.0, %v423_v53  ;;  %v254_v53 = vmul.f32 0.5, %v1988_v55  ;;  %v366_v54 = vadd.f32 1.0, %v1684_v44  ;;  %v322_v63 = vadd.f32 %v306_v10, %v2029_v40 }
  0xe4   :  { %v2031_v43 = vmul.f32 %v365_v32, %v253_v28 }
  0xe5   :  { %396 = vadd.xlane.f32.xlu1 %v1983_v46  ;;  %v425_v60 = vmul.f32 %v1680_v51, %v424_v57  ;;  %v307_v57 = vmul.f32 %v291_v48, %v2016_v24  ;;  %v2052_v0 = vmul.f32 %v366_v54, %v254_v53 }
  0xe7   :  { %v426_v2 = vadd.f32 %v1680_v51, %v425_v60  ;;  %v323_v3 = vadd.f32 %v307_v57, %v2016_v24  ;;  %v1574_v57 = vld [vmem:[#allocation11 + $0xec] sm:$0xf0] }
  0xe9   :  { %v1997_v6 = vsel %vm427_vm0, %v1680_v51, %v426_v2  ;;  %v305_v51 = vmul.f32 %v289_v39, %v2010_v18  ;;  %v1686_v2 = vpop.eup %1685 }
  0xea   :  { %v367_v15 = vadd.f32 1.0, %v1686_v2  ;;  %v1573_v2 = vld [vmem:[#allocation11 + $0xec] sm:$0xf] }
  0xeb   :  { %v321_v61 = vadd.f32 %v305_v51, %v2010_v18  ;;  %v258_v51 = vmul.f32 0.5, %v2029_v40 }
  0xec   :  { %v2077_v26 = vmul.f32 %v367_v15, %v255_v14  ;;  %v1506_v14 = vld [vmem:[#allocation11 + $0xc8] sm:$0xf]  ;;  %v1571_v15 = vld [vmem:[#allocation11 + $0xd4] sm:$0xf0] }
  0xed   :  { %v337_v5 = vmul.f32 0.7978846, %v321_v61  ;;  %v1516_v61 = vld [vmem:[#allocation11 + $0xf0] sm:$0xf0] }
  0xee   :  { %v1519_v40 = vor.u32 %v1572_v58, %v1516_v61 }
  0xf0   :  { %1104 = vmatpush.bf16.msrb.mxu2 %v1519_v40  ;;  %v1556_v40 = vld [vmem:[#allocation11 + $0x64] sm:$0xf] }
 0x13f   :  { %v399_v23 = vpop.xlane.xlu2 %398 }
 0x140   :  { %v391_v8 = vpop.xlane.xlu0 %390 }
 0x141   :  { %v429_v13 = vmul.f32 %v1997_v6, %v391_v8 }
 0x143   :  { %v2006_v16 = vsub.f32 %v1966_v12, %v429_v13  ;;  %v288_v12 = vmul.f32 %v272_v17, %v2000_v7  ;;  %v339_v17 = vmul.f32 0.7978846, %v323_v3 }
 0x145   :  { %v461_v21 = vmul.f32 %v2006_v16, %v2006_v16  ;;  %v304_v36 = vmul.f32 %v288_v12, %v2000_v7 }
 0x147   :  { %477 = vadd.xlane.f32.xlu0 %v461_v21  ;;  %v401_v49 = vpop.xlane.xlu2 %400  ;;  %v433_v21 = vmul.f32 %v1997_v6, %v399_v23  ;;  %v256_v23 = vmul.f32 0.5, %v2000_v7 }
 0x148   :  { %v393_v27 = vpop.xlane.xlu0 %392  ;;  %v434_v62 = vmul.f32 %v1997_v6, %v401_v49 }
 0x149   :  { %v430_v33 = vmul.f32 %v1997_v6, %v393_v27  ;;  %v2083_v28 = vsub.f32 %v1964_v11, %v433_v21  ;;  %v257_v11 = vmul.f32 0.5, %v2010_v18  ;;  %v260_v18 = vmul.f32 0.5, %v2036_v47  ;;  %v1569_v21 = vld [vmem:[#allocation11 + $0xcc] sm:$0xf] }
 0x14a   :  { %v2061_v8 = vsub.f32 %v1971_v30, %v434_v62  ;;  %v1522_v62 = vld [vmem:[#allocation11 + $0xe8] sm:$0xf] }
 0x14b   :  { %v2025_v37 = vsub.f32 %v1973_v31, %v430_v33  ;;  %v320_v31 = vadd.f32 %v304_v36, %v2000_v7  ;;  %v338_v33 = vmul.f32 0.7978846, %v322_v63  ;;  %v465_v39 = vmul.f32 %v2083_v28, %v2083_v28  ;;  %v1566_v63 = vld [vmem:[#allocation11 + $0xac] sm:$0xf0] }
 0x14c   :  { %v466_v25 = vmul.f32 %v2061_v8, %v2061_v8  ;;  %v259_v7 = vmul.f32 0.5, %v2016_v24 }
 0x14d   :  { %v462_v45 = vmul.f32 %v2025_v37, %v2025_v37  ;;  %v336_v60 = vmul.f32 0.7978846, %v320_v31 }
 0x14f   :  { %404 = vadd.xlane.f32.xlu0 %v2031_v43  ;;  %479 = vadd.xlane.f32.xlu1 %v462_v45  ;;  %1687 = vtanh.f32 %v336_v60  ;;  %v403_v13 = vpop.xlane.xlu2 %402  ;;  %v1515_v60 = vor.u32 %v1574_v57, %v1514_v56  ;;  %v1561_v56 = vld [vmem:[#allocation11 + $0x8c] sm:$0xf]  ;;  %v1476_v57 = vld [vmem:[#allocation11 + $0x98] sm:$0xf0] }
 0x150   :  { %v395_v50 = vpop.xlane.xlu1 %394  ;;  %1689 = vtanh.f32 %v337_v5  ;;  %v435_v30 = vmul.f32 %v1997_v6, %v403_v13  ;;  %v1570_v5 = vld [vmem:[#allocation11 + $0xcc] sm:$0xf0]  ;;  %v1500_v13 = vld [vmem:[#allocation11 + $0xd0] sm:$0xf0]  ;;  %v1479_v58 = vor.u32 %v1561_v56, %v1476_v57  ;;  %v1428_v56 = vld [vmem:[#allocation11 + $0x38] sm:$0xf0] }
 0x151   :  { %v431_v52 = vmul.f32 %v1997_v6, %v395_v50  ;;  %1691 = vtanh.f32 %v339_v17  ;;  %1055 = vmatpush.bf16.msrb.mxu1 %v1515_v60 }
 0x152   :  { %v2086_v32 = vsub.f32 %v1977_v41, %v435_v30  ;;  %1693 = vtanh.f32 %v338_v33  ;;  %v2112_v30 = vadd.f32 %v1956_v29, %v243_v4  ;;  %v1490_v33 = vld [vmem:[#allocation11 + $0xa8] sm:$0xf]  ;;  %v1559_v4 = vld [vmem:[#allocation11 + $0x74] sm:$0xf0] }
 0x153   :  { %v2048_v59 = vsub.f32 %v1979_v42, %v431_v52 }
 0x154   :  { %v467_v44 = vmul.f32 %v2086_v32, %v2086_v32  ;;  %v277_v29 = vmul.f32 0.044715, %v2112_v30 }
 0x155   :  { %v463_v55 = vmul.f32 %v2048_v59, %v2048_v59  ;;  %v1688_v22 = vpop.eup %1687 }
 0x156   :  { %v368_v27 = vadd.f32 1.0, %v1688_v22  ;;  %v1690_v34 = vpop.eup %1689  ;;  %v1508_v22 = vld [vmem:[#allocation11 + $0xd8] sm:$0xf0]  ;;  %v293_v60 = vmul.f32 %v277_v29, %v2112_v30 }
 0x157   :  { %406 = vadd.xlane.f32.xlu0 %v2052_v0  ;;  %481 = vadd.xlane.f32.xlu1 %v463_v55  ;;  %v1692_v36 = vpop.eup %1691  ;;  %v369_v41 = vadd.f32 1.0, %v1690_v34  ;;  %v1575_v55 = vld [vmem:[#allocation11 + $0xf4] sm:$0xf0] }
 0x158   :  { %v397_v42 = vpop.xlane.xlu1 %396  ;;  %v2088_v38 = vmul.f32 %v368_v27, %v256_v23  ;;  %v371_v45 = vadd.f32 1.0, %v1692_v36  ;;  %v1694_v48 = vpop.eup %1693  ;;  %v1523_v1 = vor.u32 %v1575_v55, %v1522_v62  ;;  %v1484_v27 = vld [vmem:[#allocation11 + $0xb0] sm:$0xf0]  ;;  %v1567_v34 = vld [vmem:[#allocation11 + $0xb4] sm:$0xf0] }
 0x159   :  { %v432_v9 = vmul.f32 %v1997_v6, %v397_v42  ;;  %v2097_v31 = vmul.f32 %v369_v41, %v257_v11  ;;  %v370_v52 = vadd.f32 1.0, %v1694_v48  ;;  %v1498_v42 = vld [vmem:[#allocation11 + $0xc0] sm:$0xf]  ;;  %v1491_v36 = vor.u32 %v1567_v34, %v1490_v33  ;;  %v1558_v55 = vld [vmem:[#allocation11 + $0x6c] sm:$0xf0] }
 0x15a   :  { %v2099_v49 = vmul.f32 %v371_v45, %v259_v7  ;;  %1153 = vmatpush.bf16.msrb.mxu3 %v1523_v1  ;;  %v1499_v10 = vor.u32 %v1570_v5, %v1498_v42  ;;  %v1466_v41 = vld [vmem:[#allocation11 + $0x80] sm:$0xf]  ;;  %v1562_v7 = vld [vmem:[#allocation11 + $0x8c] sm:$0xf0]  ;;  %v1560_v45 = vld [vmem:[#allocation11 + $0x84] sm:$0xf] }
 0x15b   :  { %v2068_v20 = vsub.f32 %v1983_v46, %v432_v9  ;;  %v324_v46 = vadd.f32 %v308_v19, %v2036_v47  ;;  %v2105_v24 = vmul.f32 %v370_v52, %v258_v51  ;;  %v1524_v47 = vld [vmem:[#allocation11 + $0xf8] sm:$0xf0]  ;;  %v1568_v9 = vld [vmem:[#allocation11 + $0xc4] sm:$0xf]  ;;  %v1507_v19 = vor.u32 %v1571_v15, %v1506_v14  ;;  %v1474_v51 = vld [vmem:[#allocation11 + $0x88] sm:$0xf] }
 0x15c   :  { %v1527_v3 = vor.u32 %v1573_v2, %v1524_v47  ;;  %v1503_v17 = vor.u32 %v1568_v9, %v1500_v13  ;;  %1056 = vmatpush.bf16.msrb.mxu1 %v1499_v10  ;;  %v1467_v48 = vor.u32 %v1562_v7, %v1466_v41  ;;  %v1563_v52 = vld [vmem:[#allocation11 + $0x94] sm:$0xf0]  ;;  %v1450_v62 = vld [vmem:[#allocation11 + $0x60] sm:$0xf]  ;;  %v1452_v47 = vld [vmem:[#allocation11 + $0x70] sm:$0xf0]  ;;  %v309_v14 = vmul.f32 %v293_v60, %v2112_v30 }
 0x15d   :  { %v464_v12 = vmul.f32 %v2068_v20, %v2068_v20  ;;  %v340_v35 = vmul.f32 0.7978846, %v324_v46  ;;  %v1564_v46 = vld [vmem:[#allocation11 + $0xa4] sm:$0xf]  ;;  %v1451_v2 = vor.u32 %v1558_v55, %v1450_v62  ;;  %v1455_v42 = vor.u32 %v1556_v40, %v1452_v47  ;;  %v1557_v9 = vld [vmem:[#allocation11 + $0x6c] sm:$0xf] }
 0x15e   :  { %1202 = vmatpush.bf16.msrb.mxu0 %v1527_v3  ;;  %1105 = vmatpush.bf16.msrb.mxu2 %v1503_v17  ;;  %v1458_v3 = vld [vmem:[#allocation11 + $0x68] sm:$0xf]  ;;  %v1460_v10 = vld [vmem:[#allocation11 + $0x78] sm:$0xf0]  ;;  %v1434_v17 = vld [vmem:[#allocation11 + $0x40] sm:$0xf]  ;;  %v325_v34 = vadd.f32 %v309_v14, %v2112_v30 }
 0x15f   :  { %483 = vadd.xlane.f32.xlu2 %v464_v12  ;;  %487 = vadd.xlane.f32.xlu0 %v466_v25  ;;  %1695 = vtanh.f32 %v340_v35  ;;  %v1511_v12 = vor.u32 %v1569_v21, %v1508_v22  ;;  %v1482_v25 = vld [vmem:[#allocation11 + $0xa0] sm:$0xf]  ;;  %v1487_v35 = vor.u32 %v1564_v46, %v1484_v27  ;;  %v1459_v5 = vor.u32 %v1559_v4, %v1458_v3  ;;  %v1552_v21 = vld [vmem:[#allocation11 + $0x44] sm:$0xf]  ;;  %v1553_v27 = vld [vmem:[#allocation11 + $0x4c] sm:$0xf] }
 0x160   :  { %408 = vadd.xlane.f32.xlu1 %v2077_v26  ;;  %1154 = vmatpush.bf16.msrb.mxu3 %v1507_v19  ;;  %v1483_v23 = vor.u32 %v1566_v63, %v1482_v25  ;;  %v1463_v15 = vor.u32 %v1557_v9, %v1460_v10  ;;  %v1554_v19 = vld [vmem:[#allocation11 + $0x4c] sm:$0xf0]  ;;  %v1442_v25 = vld [vmem:[#allocation11 + $0x48] sm:$0xf]  ;;  %v1555_v63 = vld [vmem:[#allocation11 + $0x54] sm:$0xf0] }
 0x161   :  { %v1435_v22 = vor.u32 %v1554_v19, %v1434_v17  ;;  %v1444_v33 = vld [vmem:[#allocation11 + $0x58] sm:$0xf0]  ;;  %v341_v60 = vmul.f32 0.7978846, %v325_v34  ;;  %v1402_v40 = vld [vmem:[#allocation11] sm:$0xf] }
 0x162   :  { %1203 = vmatpush.bf16.msrb.mxu0 %v1511_v12  ;;  %1057 = vmatpush.bf16.msrb.mxu1 %v1483_v23  ;;  %v1436_v12 = vld [vmem:[#allocation11 + $0x50] sm:$0xf0]  ;;  %v1443_v23 = vor.u32 %v1555_v63, %v1442_v25  ;;  %v1544_v3 = vld [vmem:[#allocation11 + $0x4] sm:$0xf]  ;;  %v1547_v9 = vld [vmem:[#allocation11 + $0x14] sm:$0xf0] }
 0x163   :  { %1106 = vmatpush.bf16.msrb.mxu2 %v1487_v35  ;;  %v1439_v46 = vor.u32 %v1552_v21, %v1436_v12  ;;  %v1447_v35 = vor.u32 %v1553_v27, %v1444_v33  ;;  %v1545_v10 = vld [vmem:[#allocation11 + $0xc] sm:$0xf] }
 0x164   :  { %1155 = vmatpush.bf16.msrb.mxu3 %v1491_v36 }
 0x165   :  { %v1696_v50 = vpop.eup %1695 }
 0x166   :  { %v372_v53 = vadd.f32 1.0, %v1696_v50  ;;  %v1468_v50 = vld [vmem:[#allocation11 + $0x90] sm:$0xf0]  ;;  %1058 = vmatpush.bf16.msrb.mxu1 %v1467_v48  ;;  %v1426_v48 = vld [vmem:[#allocation11 + $0x28] sm:$0xf] }
 0x167   :  { %485 = vadd.xlane.f32.xlu2 %v465_v39  ;;  %489 = vadd.xlane.f32.xlu0 %v467_v44  ;;  %v1565_v39 = vld [vmem:[#allocation11 + $0xac] sm:$0xf]  ;;  %v1492_v44 = vld [vmem:[#allocation11 + $0xb8] sm:$0xf0] }
 0x168   :  { %410 = vadd.xlane.f32.xlu1 %v2088_v38  ;;  %v2107_v54 = vmul.f32 %v372_v53, %v260_v18  ;;  %v1495_v11 = vor.u32 %v1565_v39, %v1492_v44  ;;  %v1471_v18 = vor.u32 %v1560_v45, %v1468_v50  ;;  %v1475_v53 = vor.u32 %v1563_v52, %v1474_v51  ;;  %v1418_v39 = vld [vmem:[#allocation11 + $0x20] sm:$0xf]  ;;  %v1550_v44 = vld [vmem:[#allocation11 + $0x2c] sm:$0xf0]  ;;  %v1420_v45 = vld [vmem:[#allocation11 + $0x30] sm:$0xf0] }
 0x169   :  { %v1419_v7 = vor.u32 %v1550_v44, %v1418_v39  ;;  %v1551_v50 = vld [vmem:[#allocation11 + $0x34] sm:$0xf0] }
 0x16a   :  { %1204 = vmatpush.bf16.msrb.mxu0 %v1495_v11  ;;  %1107 = vmatpush.bf16.msrb.mxu2 %v1471_v18  ;;  %v1548_v11 = vld [vmem:[#allocation11 + $0x24] sm:$0xf]  ;;  %v1427_v18 = vor.u32 %v1551_v50, %v1426_v48 }
 0x16b   :  { %1156 = vmatpush.bf16.msrb.mxu3 %v1475_v53  ;;  %1059 = vmatpush.bf16.msrb.mxu1 %v1451_v2  ;;  %v1423_v52 = vor.u32 %v1548_v11, %v1420_v45  ;;  %v1549_v53 = vld [vmem:[#allocation11 + $0x2c] sm:$0xf] }
 0x16e   :  { %1205 = vmatpush.bf16.msrb.mxu0 %v1479_v58  ;;  %1108 = vmatpush.bf16.msrb.mxu2 %v1455_v42 }
 0x16f   :  { %412 = vadd.xlane.f32.xlu2 %v2097_v31  ;;  %416 = vadd.xlane.f32.xlu0 %v2099_v49 }
 0x170   :  { %1157 = vmatpush.bf16.msrb.mxu3 %v1459_v5  ;;  %1060 = vmatpush.bf16.msrb.mxu1 %v1435_v22  ;;  %v1410_v5 = vld [vmem:[#allocation11 + $0x8] sm:$0xf] }
 0x171   :  { %v1411_v14 = vor.u32 %v1547_v9, %v1410_v5 }
 0x172   :  { %1206 = vmatpush.bf16.msrb.mxu0 %v1463_v15  ;;  %1109 = vmatpush.bf16.msrb.mxu2 %v1439_v46  ;;  %v1412_v15 = vld [vmem:[#allocation11 + $0x18] sm:$0xf0] }
 0x173   :  { %v1415_v21 = vor.u32 %v1545_v10, %v1412_v15 }
 0x174   :  { %1158 = vmatpush.bf16.msrb.mxu3 %v1443_v23  ;;  %1061 = vmatpush.bf16.msrb.mxu1 %v1419_v7 }
 0x176   :  { %1207 = vmatpush.bf16.msrb.mxu0 %v1447_v35  ;;  %1110 = vmatpush.bf16.msrb.mxu2 %v1423_v52 }
 0x177   :  { %414 = vadd.xlane.f32.xlu2 %v2105_v24  ;;  %418 = vadd.xlane.f32.xlu0 %v2107_v54 }
 0x178   :  { %1159 = vmatpush.bf16.msrb.mxu3 %v1427_v18 }
 0x17c   :  { %1160 = vmatpush.bf16.msrb.mxu3 %v1411_v14 }
 0x1ba   :  { %v478_v61 = vpop.xlane.xlu0 %477 }
 0x1bb   :  { %v509_v1 = vmul.f32 %v478_v61, %v1997_v6  ;;  %v1431_v61 = vor.u32 %v1549_v53, %v1428_v56 }
 0x1bd   :  { %v2117_v13 = vadd.f32 1e-12, %v509_v1  ;;  %v1546_v1 = vld [vmem:[#allocation11 + $0xc] sm:$0xf0]  ;;  %1208 = vmatpush.bf16.msrb.mxu0 %v1431_v61 }
 0x1be   :  { %v1403_v47 = vor.u32 %v1546_v1, %v1402_v40 }
 0x1bf   :  { %1697 = vrsqrt.f32 %v2117_v13  ;;  %vm548_vm2 = vweird.f32 %v2117_v13 }
 0x1c0   :  { %1062 = vmatpush.bf16.msrb.mxu1 %v1403_v47 }
 0x1c1   :  { %1209 = vmatpush.bf16.msrb.mxu0 %v1415_v21 }
 0x1c2   :  { %v405_v36 = vpop.xlane.xlu0 %404  ;;  %v480_v29 = vpop.xlane.xlu1 %479 }
 0x1c3   :  { %v436_v41 = vmul.f32 %v1997_v6, %v405_v36  ;;  %v510_v51 = vmul.f32 %v480_v29, %v1997_v6 }
 0x1c5   :  { %v2124_v57 = vpop.eup %1697  ;;  %v2127_v58 = vsub.f32 %v2031_v43, %v436_v41  ;;  %v2131_v55 = vadd.f32 1e-12, %v510_v51  ;;  %v1404_v43 = vld [vmem:[#allocation11 + $0x10] sm:$0xf0]  ;;  %v261_v41 = vmul.f32 0.5, %v2112_v30 }
 0x1c6   :  { %v543_v62 = vmul.f32 %v2124_v57, %v2117_v13  ;;  %v1407_v42 = vor.u32 %v1544_v3, %v1404_v43  ;;  %vm549_vm1 = vweird.f32 %v2124_v57 }
 0x1c7   :  { %v468_v2 = vmul.f32 %v2127_v58, %v2127_v58  ;;  %1699 = vrsqrt.f32 %v2131_v55  ;;  %vm2153_vm3 = vmor %vm548_vm2, %vm549_vm1  ;;  %vm558_vm5 = vweird.f32 %v2131_v55 }
 0x1c8   :  { %v544_v4 = vmul.f32 %v2124_v57, %v543_v62  ;;  %1701 = vtanh.f32 %v341_v60  ;;  %1111 = vmatpush.bf16.msrb.mxu2 %v1407_v42 }
 0x1c9   :  { %491 = vadd.xlane.f32.xlu1 %v468_v2 }
 0x1ca   :  { %v545_v17 = vmul.f32 0.5, %v544_v4  ;;  %v407_v19 = vpop.xlane.xlu0 %406  ;;  %v482_v22 = vpop.xlane.xlu1 %481 }
 0x1cb   :  { %v437_v12 = vmul.f32 %v1997_v6, %v407_v19  ;;  %v511_v63 = vmul.f32 %v482_v22, %v1997_v6 }
 0x1cc   :  { %v546_v25 = vsub.f32 1.5, %v545_v17 }
 0x1cd   :  { %v2140_v46 = vsub.f32 %v2052_v0, %v437_v12  ;;  %v1700_v23 = vpop.eup %1699  ;;  %v2142_v27 = vadd.f32 1e-12, %v511_v63  ;;  %v2151_v0 = vld [vmem:[#allocation8] ss:$0 sm:$0xff] }
 0x1ce   :  { %v1702_v33 = vpop.eup %1701  ;;  %v547_v34 = vmul.f32 %v2124_v57, %v546_v25  ;;  %v553_v35 = vmul.f32 %v1700_v23, %v2131_v55  ;;  %vm559_vm4 = vweird.f32 %v1700_v23 }
 0x1cf   :  { %v469_v36 = vmul.f32 %v2140_v46, %v2140_v46  ;;  %1703 = vrsqrt.f32 %v2142_v27  ;;  %v373_v7 = vadd.f32 1.0, %v1702_v33  ;;  %vm560_vm6 = vmor %vm558_vm5, %vm559_vm4  ;;  %vm568_vm8 = vweird.f32 %v2142_v27 }
 0x1d0   :  { %v554_v39 = vmul.f32 %v1700_v23, %v553_v35  ;;  %v551_v45 = vsel %vm2153_vm3, %v2124_v57, %v547_v34 }
 0x1d1   :  { %493 = vadd.xlane.f32.xlu1 %v469_v36  ;;  %v705_v60 = vmul.f32 %v2151_v0, %v551_v45  ;;  %v2172_v57 = vmul.f32 %v373_v7, %v261_v41 }
 0x1d2   :  { %v484_v11 = vpop.xlane.xlu2 %483  ;;  %v488_v29 = vpop.xlane.xlu0 %487  ;;  %v555_v48 = vmul.f32 0.5, %v554_v39 }
 0x1d3   :  { %v512_v13 = vmul.f32 %v484_v11, %v1997_v6  ;;  %v409_v50 = vpop.xlane.xlu1 %408  ;;  %v514_v51 = vmul.f32 %v488_v29, %v1997_v6  ;;  %v721_v3 = vmul.f32 %v705_v60, %v2006_v16 }
 0x1d4   :  { %v438_v52 = vmul.f32 %v1997_v6, %v409_v50  ;;  %v556_v18 = vsub.f32 1.5, %v555_v48 }
 0x1d5   :  { %v2164_v53 = vadd.f32 1e-12, %v512_v13  ;;  %v2166_v56 = vadd.f32 1e-12, %v514_v51  ;;  %v1704_v30 = vpop.eup %1703 }
 0x1d6   :  { %v2170_v61 = vsub.f32 %v2077_v26, %v438_v52  ;;  %v557_v62 = vmul.f32 %v1700_v23, %v556_v18  ;;  %v563_v40 = vmul.f32 %v1704_v30, %v2142_v27  ;;  %v2181_v26 = vld [vmem:[#allocation9] ss:$0 sm:$0xff]  ;;  %vm569_vm7 = vweird.f32 %v1704_v30 }
 0x1d7   :  { %1705 = vrsqrt.f32 %v2164_v53  ;;  %v741_v21 = vadd.f32 %v2181_v26, %v721_v3  ;;  %vm570_vm9 = vmor %vm568_vm8, %vm569_vm7  ;;  %vm578_vm11 = vweird.f32 %v2164_v53  ;;  %vm598_vm14 = vweird.f32 %v2166_v56 }
 0x1d8   :  { %1707 = vrsqrt.f32 %v2166_v56  ;;  %v470_v1 = vmul.f32 %v2170_v61, %v2170_v61  ;;  %v561_v2 = vsel %vm560_vm6, %v1700_v23, %v557_v62  ;;  %v564_v47 = vmul.f32 %v1704_v30, %v563_v40 }
 0x1d9   :  { %420 = vadd.xlane.f32.xlu1 %v2172_v57  ;;  %v706_v55 = vmul.f32 %v2151_v0, %v561_v2 }
 0x1da   :  { %495 = vadd.xlane.f32.xlu2 %v470_v1  ;;  %v486_v43 = vpop.xlane.xlu2 %485  ;;  %v2185_v4 = vpop.xlane.xlu0 %489  ;;  %v565_v42 = vmul.f32 0.5, %v564_v47 }
 0x1db   :  { %v513_v5 = vmul.f32 %v486_v43, %v1997_v6  ;;  %v411_v9 = vpop.xlane.xlu1 %410  ;;  %v722_v10 = vmul.f32 %v706_v55, %v2025_v37 }
 0x1dc   :  { %v439_v14 = vmul.f32 %v1997_v6, %v411_v9  ;;  %v566_v17 = vsub.f32 1.5, %v565_v42 }
 0x1dd   :  { %v1706_v15 = vpop.eup %1705  ;;  %v2190_v19 = vadd.f32 1e-12, %v513_v5  ;;  %v742_v22 = vadd.f32 %v2181_v26, %v722_v10 }
 0x1de   :  { %v1708_v16 = vpop.eup %1707  ;;  %v573_v12 = vmul.f32 %v1706_v15, %v2164_v53  ;;  %v2196_v25 = vsub.f32 %v2088_v38, %v439_v14  ;;  %v567_v63 = vmul.f32 %v1704_v30, %v566_v17  ;;  %vm579_vm10 = vweird.f32 %v1706_v15 }
 0x1df   :  { %v593_v37 = vmul.f32 %v1708_v16, %v2166_v56  ;;  %1709 = vrsqrt.f32 %v2190_v19  ;;  %v1579_v23 = vpack.c.bf16 %v742_v22, %v741_v21  ;;  %vm599_vm12 = vweird.f32 %v1708_v16  ;;  %vm580_vm13 = vmor %vm578_vm11, %vm579_vm10 }
 0x1e0   :  { %v574_v33 = vmul.f32 %v1706_v15, %v573_v12  ;;  %v571_v34 = vsel %vm570_vm9, %v1704_v30, %v567_v63  ;;  %v471_v36 = vmul.f32 %v2196_v25, %v2196_v25  ;;  %vm2221_vm15 = vmor %vm598_vm14, %vm599_vm12  ;;  %vm588_vm1 = vweird.f32 %v2190_v19 }
 0x1e1   :  { %v594_v35 = vmul.f32 %v1708_v16, %v593_v37  ;;  %1580 = vst [vmem:[#allocation2 + $0x30] sm:$0xff] %v1579_v23   ;;  %v707_v41 = vmul.f32 %v2151_v0, %v571_v34 }
 0x1e2   :  { %v575_v39 = vmul.f32 0.5, %v574_v33  ;;  %v413_v44 = vpop.xlane.xlu2 %412  ;;  %v417_v38 = vpop.xlane.xlu0 %416  ;;  %497 = vadd.xlane.f32.xlu2 %v471_v36 }
 0x1e3   :  { %v595_v11 = vmul.f32 0.5, %v594_v35  ;;  %v440_v27 = vmul.f32 %v1997_v6, %v413_v44  ;;  %v442_v29 = vmul.f32 %v1997_v6, %v417_v38  ;;  %v723_v60 = vmul.f32 %v707_v41, %v2048_v59 }
 0x1e4   :  { %v576_v7 = vsub.f32 1.5, %v575_v39 }
 0x1e5   :  { %v1710_v45 = vpop.eup %1709  ;;  %v596_v48 = vsub.f32 1.5, %v595_v11  ;;  %v2207_v13 = vsub.f32 %v2097_v31, %v440_v27  ;;  %v2210_v50 = vsub.f32 %v2099_v49, %v442_v29  ;;  %v743_v42 = vadd.f32 %v2181_v26, %v723_v60 }
 0x1e6   :  { %v577_v51 = vmul.f32 %v1706_v15, %v576_v7  ;;  %v583_v52 = vmul.f32 %v1710_v45, %v2190_v19  ;;  %vm589_vm0 = vweird.f32 %v1710_v45 }
 0x1e7   :  { %v597_v18 = vmul.f32 %v1708_v16, %v596_v48  ;;  %v472_v30 = vmul.f32 %v2207_v13, %v2207_v13  ;;  %v474_v49 = vmul.f32 %v2210_v50, %v2210_v50  ;;  %vm590_vm2 = vmor %vm588_vm1, %vm589_vm0 }
 0x1e8   :  { %v581_v31 = vsel %vm580_vm13, %v1706_v15, %v577_v51  ;;  %v584_v62 = vmul.f32 %v1710_v45, %v583_v52  ;;  %v1536_v1 = vld [vmem:[#allocation2 + $0x30] sm:$0xff] }
 0x1e9   :  { %v708_v40 = vmul.f32 %v2151_v0, %v581_v31  ;;  %499 = vadd.xlane.f32.xlu0 %v472_v30  ;;  %v601_v56 = vsel %vm2221_vm15, %v1708_v16, %v597_v18  ;;  %1063 = vmatmul.bf16.vlgmr.msrb.gmra.mxu1 %v1536_v1 }
 0x1ea   :  { %v585_v2 = vmul.f32 0.5, %v584_v62  ;;  %v415_v47 = vpop.xlane.xlu2 %414  ;;  %v419_v3 = vpop.xlane.xlu0 %418  ;;  %503 = vadd.xlane.f32.xlu2 %v474_v49  ;;  %1112 = vmatmul.bf16.vlgmr.msrb.gmra.mxu2 %v1536_v1  ;;  %v710_v10 = vmul.f32 %v2151_v0, %v601_v56 }
 0x1eb   :  { %v724_v59 = vmul.f32 %v708_v40, %v2068_v20  ;;  %v441_v55 = vmul.f32 %v1997_v6, %v415_v47  ;;  %v443_v43 = vmul.f32 %v1997_v6, %v419_v3  ;;  %1161 = vmatmul.bf16.vlgmr.msrb.gmra.mxu3 %v1536_v1  ;;  %1210 = vmatmul.bf16.vlgmr.msrb.gmra.mxu0 %v1536_v1 }
 0x1ec   :  { %v586_v5 = vsub.f32 1.5, %v585_v2 }
 0x1ed   :  { %v744_v9 = vadd.f32 %v2181_v26, %v724_v59  ;;  %v2234_v14 = vsub.f32 %v2105_v24, %v441_v55  ;;  %v2237_v20 = vsub.f32 %v2107_v54, %v443_v43  ;;  %v726_v24 = vmul.f32 %v710_v10, %v2061_v8 }
 0x1ee   :  { %v587_v15 = vmul.f32 %v1710_v45, %v586_v5  ;;  %v515_v8 = vmul.f32 %v2185_v4, %v1997_v6 }
 0x1ef   :  { %v1584_v17 = vpack.c.bf16 %v744_v9, %v743_v42  ;;  %v473_v16 = vmul.f32 %v2234_v14, %v2234_v14  ;;  %v475_v21 = vmul.f32 %v2237_v20, %v2237_v20  ;;  %v746_v19 = vadd.f32 %v2181_v26, %v726_v24 }
 0x1f0   :  { %v591_v22 = vsel %vm590_vm2, %v1710_v45, %v587_v15 }
 0x1f1   :  { %1616 = vst [vmem:[#allocation2] sm:$0xff] %v1584_v17   ;;  %v709_v12 = vmul.f32 %v2151_v0, %v591_v22  ;;  %501 = vadd.xlane.f32.xlu1 %v473_v16  ;;  %505 = vadd.xlane.f32.xlu0 %v475_v21 }
 0x1f3   :  { %v725_v54 = vmul.f32 %v709_v12, %v2083_v28  ;;  %v532_v28 = vadd.f32 1e-12, %v515_v8 }
 0x1f5   :  { %v745_v63 = vadd.f32 %v2181_v26, %v725_v54  ;;  %1711 = vrsqrt.f32 %v532_v28  ;;  %vm608_vm4 = vweird.f32 %v532_v28 }
 0x1f7   :  { %v1589_v37 = vpack.c.bf16 %v746_v19, %v745_v63 }
 0x1f8   :  { %v1537_v23 = vld [vmem:[#allocation2] sm:$0xff] }
 0x1f9   :  { %1617 = vst [vmem:[#allocation2 + $0x18] sm:$0xff] %v1589_v37   ;;  %1068 = vmatmul.bf16.gmra.mxu1 %v1537_v23 }
 0x1fa   :  { %1117 = vmatmul.bf16.gmra.mxu2 %v1537_v23 }
 0x1fb   :  { %1166 = vmatmul.bf16.gmra.mxu3 %v1537_v23  ;;  %1215 = vmatmul.bf16.gmra.mxu0 %v1537_v23  ;;  %v1712_v34 = vpop.eup %1711 }
 0x1fc   :  { %v603_v35 = vmul.f32 %v1712_v34, %v532_v28  ;;  %vm609_vm3 = vweird.f32 %v1712_v34 }
 0x1fd   :  { %vm610_vm5 = vmor %vm608_vm4, %vm609_vm3 }
 0x1fe   :  { %v604_v36 = vmul.f32 %v1712_v34, %v603_v35 }
 0x200   :  { %v1538_v33 = vld [vmem:[#allocation2 + $0x18] sm:$0xff]  ;;  %v605_v11 = vmul.f32 0.5, %v604_v36 }
 0x202   :  { %v606_v27 = vsub.f32 1.5, %v605_v11  ;;  %v837_v11 = vld [vmem:[%s2402_s6] sm:$0xf]  ;;  %s1895_s6 = smov [#allocation12]  }
 0x203   :  { %s1319_s30 = sshll.u32 %s1895_s6, 4  ;;  %s1320_s30 = int_to_ptr.vmem [resolvable:$true] %s1319_s30 }
 0x204   :  { %v607_v48 = vmul.f32 %v1712_v34, %v606_v27 }
 0x206   :  { %v611_v52 = vsel %vm610_vm5, %v1712_v34, %v607_v48 }
 0x207   :  { %v711_v53 = vmul.f32 %v2151_v0, %v611_v52 }
 0x209   :  { %1073 = vmatmul.bf16.gmra.mxu1 %v1538_v33  ;;  %v727_v43 = vmul.f32 %v711_v53, %v2086_v32 }
 0x20a   :  { %1122 = vmatmul.bf16.gmra.mxu2 %v1538_v33 }
 0x20b   :  { %1171 = vmatmul.bf16.gmra.mxu3 %v1538_v33  ;;  %1220 = vmatmul.bf16.gmra.mxu0 %v1538_v33  ;;  %v747_v15 = vadd.f32 %v2181_v26, %v727_v43 }
 0x23c   :  { %v492_v39 = vpop.xlane.xlu1 %491 }
 0x23d   :  { %v516_v44 = vmul.f32 %v492_v39, %v1997_v6 }
 0x23f   :  { %v533_v38 = vadd.f32 1e-12, %v516_v44 }
 0x241   :  { %1713 = vrsqrt.f32 %v533_v38  ;;  %vm618_vm7 = vweird.f32 %v533_v38 }
 0x244   :  { %v494_v29 = vpop.xlane.xlu1 %493 }
 0x245   :  { %v517_v41 = vmul.f32 %v494_v29, %v1997_v6 }
 0x247   :  { %v1714_v7 = vpop.eup %1713  ;;  %v534_v45 = vadd.f32 1e-12, %v517_v41 }
 0x248   :  { %v613_v4 = vmul.f32 %v1714_v7, %v533_v38  ;;  %vm619_vm6 = vweird.f32 %v1714_v7 }
 0x249   :  { %1715 = vrsqrt.f32 %v534_v45  ;;  %vm620_vm8 = vmor %vm618_vm7, %vm619_vm6  ;;  %vm628_vm10 = vweird.f32 %v534_v45 }
 0x24a   :  { %v614_v51 = vmul.f32 %v1714_v7, %v613_v4  ;;  %v2282_v4 = vperm.slane %v837_v11, 0 }
 0x24c   :  { %v615_v18 = vmul.f32 0.5, %v614_v51  ;;  %v421_v30 = vpop.xlane.xlu1 %420 }
 0x24d   :  { %v496_v60 = vpop.xlane.xlu2 %495  ;;  %v444_v31 = vmul.f32 %v1997_v6, %v421_v30 }
 0x24e   :  { %v616_v62 = vsub.f32 1.5, %v615_v18  ;;  %v518_v49 = vmul.f32 %v496_v60, %v1997_v6  ;;  %v2287_v60 = vperm.slane %v837_v11, 3 }
 0x24f   :  { %v1716_v40 = vpop.eup %1715  ;;  %v2257_v1 = vsub.f32 %v2172_v57, %v444_v31 }
 0x250   :  { %v617_v56 = vmul.f32 %v1714_v7, %v616_v62  ;;  %v623_v2 = vmul.f32 %v1716_v40, %v534_v45  ;;  %v535_v47 = vadd.f32 1e-12, %v518_v49  ;;  %vm629_vm9 = vweird.f32 %v1716_v40 }
 0x251   :  { %v476_v3 = vmul.f32 %v2257_v1, %v2257_v1  ;;  %vm630_vm11 = vmor %vm628_vm10, %vm629_vm9 }
 0x252   :  { %v621_v59 = vsel %vm620_vm8, %v1714_v7, %v617_v56  ;;  %v624_v55 = vmul.f32 %v1716_v40, %v623_v2  ;;  %1717 = vrsqrt.f32 %v535_v47  ;;  %vm638_vm13 = vweird.f32 %v535_v47 }
 0x253   :  { %v712_v42 = vmul.f32 %v2151_v0, %v621_v59  ;;  %507 = vadd.xlane.f32.xlu1 %v476_v3 }
 0x254   :  { %v625_v5 = vmul.f32 0.5, %v624_v55 }
 0x255   :  { %v728_v57 = vmul.f32 %v712_v42, %v2127_v58  ;;  %v498_v10 = vpop.xlane.xlu2 %497  ;;  %v2296_v42 = vperm.slane %v837_v11, 1 }
 0x256   :  { %v626_v9 = vsub.f32 1.5, %v625_v5  ;;  %v519_v16 = vmul.f32 %v498_v10, %v1997_v6 }
 0x257   :  { %v748_v17 = vadd.f32 %v2181_v26, %v728_v57 }
 0x258   :  { %v1718_v21 = vpop.eup %1717  ;;  %v627_v24 = vmul.f32 %v1716_v40, %v626_v9  ;;  %v536_v32 = vadd.f32 1e-12, %v519_v16  ;;  %v2298_v9 = vperm.slane %v837_v11, 2 }
 0x259   :  { %v1594_v22 = vpack.c.bf16 %v748_v17, %v747_v15  ;;  %v633_v12 = vmul.f32 %v1718_v21, %v535_v47  ;;  %vm639_vm12 = vweird.f32 %v1718_v21 }
 0x25a   :  { %1719 = vrsqrt.f32 %v536_v32  ;;  %v631_v19 = vsel %vm630_vm11, %v1716_v40, %v627_v24  ;;  %vm640_vm14 = vmor %vm638_vm13, %vm639_vm12  ;;  %vm648_vm0 = vweird.f32 %v536_v32 }
 0x25b   :  { %1618 = vst [vmem:[#allocation2 + $0x10] sm:$0xff] %v1594_v22   ;;  %v634_v54 = vmul.f32 %v1718_v21, %v633_v12  ;;  %v713_v34 = vmul.f32 %v2151_v0, %v631_v19 }
 0x25c   :  { %v500_v58 = vpop.xlane.xlu0 %499 }
 0x25d   :  { %v635_v63 = vmul.f32 0.5, %v634_v54  ;;  %v520_v37 = vmul.f32 %v500_v58, %v1997_v6  ;;  %v504_v23 = vpop.xlane.xlu2 %503  ;;  %v729_v29 = vmul.f32 %v713_v34, %v2140_v46 }
 0x25e   :  { %v522_v8 = vmul.f32 %v504_v23, %v1997_v6 }
 0x25f   :  { %v636_v33 = vsub.f32 1.5, %v635_v63  ;;  %v2269_v28 = vadd.f32 1e-12, %v520_v37  ;;  %v749_v46 = vadd.f32 %v2181_v26, %v729_v29 }
 0x260   :  { %v1720_v35 = vpop.eup %1719  ;;  %v2272_v39 = vadd.f32 1e-12, %v522_v8 }
 0x261   :  { %v637_v36 = vmul.f32 %v1718_v21, %v636_v33  ;;  %1721 = vrsqrt.f32 %v2269_v28  ;;  %v643_v44 = vmul.f32 %v1720_v35, %v536_v32  ;;  %vm649_vm15 = vweird.f32 %v1720_v35 }
 0x262   :  { %v1539_v38 = vld [vmem:[#allocation2 + $0x10] sm:$0xff]  ;;  %1723 = vrsqrt.f32 %v2272_v39  ;;  %vm650_vm1 = vmor %vm648_vm0, %vm649_vm15  ;;  %vm658_vm4 = vweird.f32 %v2269_v28  ;;  %vm678_vm5 = vweird.f32 %v2272_v39 }
 0x263   :  { %v641_v27 = vsel %vm640_vm14, %v1718_v21, %v637_v36  ;;  %v644_v7 = vmul.f32 %v1720_v35, %v643_v44  ;;  %1078 = vmatmul.bf16.gmra.mxu1 %v1539_v38  ;;  %1127 = vmatmul.bf16.gmra.mxu2 %v1539_v38 }
 0x264   :  { %v714_v41 = vmul.f32 %v2151_v0, %v641_v27  ;;  %v502_v45 = vpop.xlane.xlu1 %501  ;;  %1176 = vmatmul.bf16.gmra.mxu3 %v1539_v38  ;;  %1225 = vmatmul.bf16.gmra.mxu0 %v1539_v38 }
 0x265   :  { %v521_v48 = vmul.f32 %v502_v45, %v1997_v6  ;;  %v645_v52 = vmul.f32 0.5, %v644_v7 }
 0x266   :  { %v730_v51 = vmul.f32 %v714_v41, %v2170_v61  ;;  %v1064_v40 = vpop.f32.mrf.mxu1 }
 0x267   :  { %v1722_v18 = vpop.eup %1721  ;;  %v2285_v30 = vadd.f32 1e-12, %v521_v48  ;;  %v646_v62 = vsub.f32 1.5, %v645_v52  ;;  %v1065_v61 = vadd.f32 %v1064_v40, %v2282_v4 }
 0x268   :  { %v750_v31 = vadd.f32 %v2181_v26, %v730_v51  ;;  %v653_v49 = vmul.f32 %v1722_v18, %v2269_v28  ;;  %v1724_v53 = vpop.eup %1723  ;;  %v1211_v3 = vpop.f32.mrf.mxu0  ;;  %vm659_vm3 = vweird.f32 %v1722_v18 }
 0x269   :  { %1725 = vrsqrt.f32 %v2285_v30  ;;  %v647_v2 = vmul.f32 %v1720_v35, %v646_v62  ;;  %v673_v47 = vmul.f32 %v1724_v53, %v2272_v39  ;;  %1251 = vst [vmem:[#allocation12] sm:$0xff] %v1065_v61  ;;  %v1212_v55 = vadd.f32 %v1211_v3, %v2287_v60  ;;  %vm660_vm6 = vmor %vm658_vm4, %vm659_vm3 }
 0x26a   :  { %v1599_v56 = vpack.c.bf16 %v750_v31, %v749_v46  ;;  %v654_v59 = vmul.f32 %v1722_v18, %v653_v49  ;;  %vm679_vm2 = vweird.f32 %v1724_v53  ;;  %vm668_vm9 = vweird.f32 %v2285_v30 }
 0x26b   :  { %v674_v43 = vmul.f32 %v1724_v53, %v673_v47  ;;  %v651_v5 = vsel %vm650_vm1, %v1720_v35, %v647_v2  ;;  %1254 = vst [vmem:[#allocation12 + $0x18] sm:$0xff] %v1212_v55  ;;  %vm2308_vm7 = vmor %vm678_vm5, %vm679_vm2 }
 0x26c   :  { %1619 = vst [vmem:[#allocation2 + $0x8] sm:$0xff] %v1599_v56   ;;  %v655_v57 = vmul.f32 0.5, %v654_v59  ;;  %v715_v22 = vmul.f32 %v2151_v0, %v651_v5 }
 0x26d   :  { %v675_v10 = vmul.f32 0.5, %v674_v43  ;;  %v1113_v16 = vpop.f32.mrf.mxu2 }
 0x26e   :  { %v656_v17 = vsub.f32 1.5, %v655_v57  ;;  %v1162_v21 = vpop.f32.mrf.mxu3  ;;  %v1114_v32 = vadd.f32 %v1113_v16, %v2296_v42  ;;  %v1066_v54 = vpop.f32.mrf.mxu1  ;;  %v731_v36 = vmul.f32 %v715_v22, %v2196_v25 }
 0x26f   :  { %v1726_v15 = vpop.eup %1725  ;;  %v676_v24 = vsub.f32 1.5, %v675_v10  ;;  %v1163_v19 = vadd.f32 %v1162_v21, %v2298_v9  ;;  %v1067_v63 = vadd.f32 %v1066_v54, %v2282_v4 }
 0x270   :  { %v663_v12 = vmul.f32 %v1726_v15, %v2285_v30  ;;  %v657_v58 = vmul.f32 %v1722_v18, %v656_v17  ;;  %1252 = vst [vmem:[#allocation12 + $0x8] sm:$0xff] %v1114_v32  ;;  %v1213_v33 = vpop.f32.mrf.mxu0  ;;  %vm669_vm8 = vweird.f32 %v1726_v15  ;;  %v751_v7 = vadd.f32 %v2181_v26, %v731_v36 }
 0x271   :  { %v677_v37 = vmul.f32 %v1724_v53, %v676_v24  ;;  %1253 = vst [vmem:[#allocation12 + $0x10] sm:$0xff] %v1163_v19  ;;  %v1214_v28 = vadd.f32 %v1213_v33, %v2287_v60  ;;  %vm670_vm10 = vmor %vm668_vm9, %vm669_vm8 }
 0x272   :  { %v664_v23 = vmul.f32 %v1726_v15, %v663_v12  ;;  %v661_v34 = vsel %vm660_vm6, %v1722_v18, %v657_v58  ;;  %1255 = vst [vmem:[#allocation12 + $0x20] sm:$0xff] %v1067_v63 }
 0x273   :  { %v1540_v35 = vld [vmem:[#allocation2 + $0x8] sm:$0xff]  ;;  %v681_v44 = vsel %vm2308_vm7, %v1724_v53, %v677_v37  ;;  %v716_v39 = vmul.f32 %v2151_v0, %v661_v34  ;;  %1258 = vst [vmem:[#allocation12 + $0x38] sm:$0xff] %v1214_v28 }
 0x274   :  { %v665_v38 = vmul.f32 0.5, %v664_v23  ;;  %1083 = vmatmul.bf16.gmra.mxu1 %v1540_v35  ;;  %1132 = vmatmul.bf16.gmra.mxu2 %v1540_v35  ;;  %v718_v29 = vmul.f32 %v2151_v0, %v681_v44  ;;  %v506_v44 = vpop.xlane.xlu0 %505 }
 0x275   :  { %v732_v11 = vmul.f32 %v716_v39, %v2207_v13  ;;  %1181 = vmatmul.bf16.gmra.mxu3 %v1540_v35  ;;  %1230 = vmatmul.bf16.gmra.mxu0 %v1540_v35  ;;  %v1115_v25 = vpop.f32.mrf.mxu2  ;;  %v523_v39 = vmul.f32 %v506_v44, %v1997_v6 }
 0x276   :  { %v666_v27 = vsub.f32 1.5, %v665_v38  ;;  %v1164_v41 = vpop.f32.mrf.mxu3  ;;  %v1116_v51 = vadd.f32 %v1115_v25, %v2296_v42  ;;  %v1069_v52 = vpop.f32.mrf.mxu1  ;;  %v734_v30 = vmul.f32 %v718_v29, %v2210_v50 }
 0x277   :  { %v752_v45 = vadd.f32 %v2181_v26, %v732_v11  ;;  %v1165_v13 = vadd.f32 %v1164_v41, %v2298_v9  ;;  %v1070_v18 = vadd.f32 %v1069_v52, %v2282_v4  ;;  %v540_v38 = vadd.f32 1e-12, %v523_v39 }
 0x278   :  { %v667_v48 = vmul.f32 %v1726_v15, %v666_v27  ;;  %1256 = vst [vmem:[#allocation12 + $0x28] sm:$0xff] %v1116_v51  ;;  %v1216_v62 = vpop.f32.mrf.mxu0  ;;  %v754_v61 = vadd.f32 %v2181_v26, %v734_v30 }
 0x279   :  { %v1604_v46 = vpack.c.bf16 %v752_v45, %v751_v7  ;;  %1257 = vst [vmem:[#allocation12 + $0x30] sm:$0xff] %v1165_v13  ;;  %v1217_v40 = vadd.f32 %v1216_v62, %v2287_v60  ;;  %1727 = vrsqrt.f32 %v540_v38  ;;  %vm688_vm12 = vweird.f32 %v540_v38 }
 0x27a   :  { %v671_v31 = vsel %vm670_vm10, %v1726_v15, %v667_v48  ;;  %1259 = vst [vmem:[#allocation12 + $0x40] sm:$0xff] %v1070_v18 }
 0x27b   :  { %v717_v49 = vmul.f32 %v2151_v0, %v671_v31  ;;  %1620 = vst [vmem:[#allocation2 + $0x20] sm:$0xff] %v1604_v46  }
 0x27c   :  { %1262 = vst [vmem:[#allocation12 + $0x58] sm:$0xff] %v1217_v40 }
 0x27d   :  { %v733_v53 = vmul.f32 %v717_v49, %v2234_v14  ;;  %v1118_v2 = vpop.f32.mrf.mxu2 }
 0x27e   :  { %v1167_v47 = vpop.f32.mrf.mxu3  ;;  %v1119_v3 = vadd.f32 %v1118_v2, %v2296_v42  ;;  %v1071_v59 = vpop.f32.mrf.mxu1 }
 0x27f   :  { %v753_v56 = vadd.f32 %v2181_v26, %v733_v53  ;;  %v1168_v50 = vadd.f32 %v1167_v47, %v2298_v9  ;;  %v1072_v43 = vadd.f32 %v1071_v59, %v2282_v4  ;;  %v1728_v11 = vpop.eup %1727 }
 0x280   :  { %1260 = vst [vmem:[#allocation12 + $0x48] sm:$0xff] %v1119_v3  ;;  %v1218_v5 = vpop.f32.mrf.mxu0  ;;  %v683_v27 = vmul.f32 %v1728_v11, %v540_v38  ;;  %vm689_vm11 = vweird.f32 %v1728_v11 }
 0x281   :  { %v1609_v55 = vpack.c.bf16 %v754_v61, %v753_v56  ;;  %v1219_v14 = vadd.f32 %v1218_v5, %v2287_v60  ;;  %1261 = vst [vmem:[#allocation12 + $0x50] sm:$0xff] %v1168_v50  ;;  %vm690_vm13 = vmor %vm688_vm12, %vm689_vm11 }
 0x282   :  { %v1541_v57 = vld [vmem:[#allocation2 + $0x20] sm:$0xff]  ;;  %1263 = vst [vmem:[#allocation12 + $0x60] sm:$0xff] %v1072_v43  ;;  %v684_v29 = vmul.f32 %v1728_v11, %v683_v27 }
 0x283   :  { %1621 = vst [vmem:[#allocation2 + $0x28] sm:$0xff] %v1609_v55  }
 0x284   :  { %1088 = vmatmul.bf16.gmra.mxu1 %v1541_v57  ;;  %1137 = vmatmul.bf16.gmra.mxu2 %v1541_v57  ;;  %1266 = vst [vmem:[#allocation12 + $0x78] sm:$0xff] %v1219_v14  ;;  %v685_v45 = vmul.f32 0.5, %v684_v29 }
 0x285   :  { %1186 = vmatmul.bf16.gmra.mxu3 %v1541_v57  ;;  %1235 = vmatmul.bf16.gmra.mxu0 %v1541_v57  ;;  %v1120_v10 = vpop.f32.mrf.mxu2 }
 0x286   :  { %v1169_v15 = vpop.f32.mrf.mxu3  ;;  %v1121_v17 = vadd.f32 %v1120_v10, %v2296_v42  ;;  %v1074_v21 = vpop.f32.mrf.mxu1  ;;  %v686_v48 = vsub.f32 1.5, %v685_v45 }
 0x287   :  { %v1170_v16 = vadd.f32 %v1169_v15, %v2298_v9  ;;  %v1075_v22 = vadd.f32 %v1074_v21, %v2282_v4 }
 0x288   :  { %1264 = vst [vmem:[#allocation12 + $0x68] sm:$0xff] %v1121_v17  ;;  %v1221_v24 = vpop.f32.mrf.mxu0  ;;  %v687_v52 = vmul.f32 %v1728_v11, %v686_v48 }
 0x289   :  { %1265 = vst [vmem:[#allocation12 + $0x70] sm:$0xff] %v1170_v16  ;;  %v1222_v12 = vadd.f32 %v1221_v24, %v2287_v60 }
 0x28a   :  { %1267 = vst [vmem:[#allocation12 + $0x80] sm:$0xff] %v1075_v22  ;;  %v1542_v8 = vld [vmem:[#allocation2 + $0x28] sm:$0xff]  ;;  %v691_v46 = vsel %vm690_vm13, %v1728_v11, %v687_v52 }
 0x28b   :  { %1270 = vst [vmem:[#allocation12 + $0x98] sm:$0xff] %v1222_v12  ;;  %v719_v30 = vmul.f32 %v2151_v0, %v691_v46 }
 0x28d   :  { %v1123_v32 = vpop.f32.mrf.mxu2  ;;  %v735_v40 = vmul.f32 %v719_v30, %v2237_v20 }
 0x28e   :  { %v1172_v54 = vpop.f32.mrf.mxu3  ;;  %v1124_v58 = vadd.f32 %v1123_v32, %v2296_v42  ;;  %v1076_v63 = vpop.f32.mrf.mxu1 }
 0x28f   :  { %v1173_v19 = vadd.f32 %v1172_v54, %v2298_v9  ;;  %v1077_v37 = vadd.f32 %v1076_v63, %v2282_v4  ;;  %v755_v56 = vadd.f32 %v2181_v26, %v735_v40 }
 0x290   :  { %1268 = vst [vmem:[#allocation12 + $0x88] sm:$0xff] %v1124_v58  ;;  %v1223_v23 = vpop.f32.mrf.mxu0 }
 0x291   :  { %1269 = vst [vmem:[#allocation12 + $0x90] sm:$0xff] %v1173_v19  ;;  %v1224_v33 = vadd.f32 %v1223_v23, %v2287_v60 }
 0x292   :  { %1271 = vst [vmem:[#allocation12 + $0xa0] sm:$0xff] %v1077_v37 }
 0x293   :  { %1274 = vst [vmem:[#allocation12 + $0xb8] sm:$0xff] %v1224_v33 }
 0x294   :  { %1093 = vmatmul.bf16.gmra.mxu1 %v1542_v8  ;;  %1142 = vmatmul.bf16.gmra.mxu2 %v1542_v8 }
 0x295   :  { %1191 = vmatmul.bf16.gmra.mxu3 %v1542_v8  ;;  %1240 = vmatmul.bf16.gmra.mxu0 %v1542_v8  ;;  %v1125_v34 = vpop.f32.mrf.mxu2 }
 0x296   :  { %v1174_v28 = vpop.f32.mrf.mxu3  ;;  %v1126_v35 = vadd.f32 %v1125_v34, %v2296_v42 }
 0x297   :  { %v1175_v36 = vadd.f32 %v1174_v28, %v2298_v9 }
 0x298   :  { %1272 = vst [vmem:[#allocation12 + $0xa8] sm:$0xff] %v1126_v35 }
 0x299   :  { %1273 = vst [vmem:[#allocation12 + $0xb0] sm:$0xff] %v1175_v36 }
 0x2c6   :  { %v508_v25 = vpop.xlane.xlu1 %507 }
 0x2c7   :  { %v524_v41 = vmul.f32 %v508_v25, %v1997_v6 }
 0x2c9   :  { %v541_v7 = vadd.f32 1e-12, %v524_v41 }
 0x2cb   :  { %1729 = vrsqrt.f32 %v541_v7  ;;  %vm698_vm15 = vweird.f32 %v541_v7 }
 0x2d1   :  { %v1730_v51 = vpop.eup %1729 }
 0x2d2   :  { %v693_v13 = vmul.f32 %v1730_v51, %v541_v7  ;;  %vm699_vm14 = vweird.f32 %v1730_v51 }
 0x2d3   :  { %vm700_vm0 = vmor %vm698_vm15, %vm699_vm14 }
 0x2d4   :  { %v694_v18 = vmul.f32 %v1730_v51, %v693_v13 }
 0x2d6   :  { %v695_v31 = vmul.f32 0.5, %v694_v18 }
 0x2d8   :  { %v696_v62 = vsub.f32 1.5, %v695_v31 }
 0x2da   :  { %v697_v49 = vmul.f32 %v1730_v51, %v696_v62 }
 0x2dc   :  { %v701_v6 = vsel %vm700_vm0, %v1730_v51, %v697_v49 }
 0x2dd   :  { %v720_v53 = vmul.f32 %v2151_v0, %v701_v6 }
 0x2df   :  { %v736_v61 = vmul.f32 %v720_v53, %v2257_v1 }
 0x2e0   :  { %v1079_v47 = vpop.f32.mrf.mxu1 }
 0x2e1   :  { %v756_v2 = vadd.f32 %v2181_v26, %v736_v61  ;;  %v1080_v3 = vadd.f32 %v1079_v47, %v2282_v4  ;;  %v1226_v50 = vpop.f32.mrf.mxu0 }
 0x2e2   :  { %v1227_v55 = vadd.f32 %v1226_v50, %v2287_v60 }
 0x2e3   :  { %v1614_v59 = vpack.c.bf16 %v756_v2, %v755_v56  ;;  %1275 = vst [vmem:[#allocation12 + $0xc0] sm:$0xff] %v1080_v3 }
 0x2e4   :  { %1278 = vst [vmem:[#allocation12 + $0xd8] sm:$0xff] %v1227_v55 }
 0x2e5   :  { %1622 = vst [vmem:[#allocation2 + $0x38] sm:$0xff] %v1614_v59  }
 0x2e6   :  { %v1128_v43 = vpop.f32.mrf.mxu2 }
 0x2e7   :  { %v1129_v20 = vadd.f32 %v1128_v43, %v2296_v42  ;;  %v1177_v0 = vpop.f32.mrf.mxu3 }
 0x2e8   :  { %v1178_v1 = vadd.f32 %v1177_v0, %v2298_v9  ;;  %v1081_v5 = vpop.f32.mrf.mxu1 }
 0x2e9   :  { %1276 = vst [vmem:[#allocation12 + $0xc8] sm:$0xff] %v1129_v20  ;;  %v1082_v26 = vadd.f32 %v1081_v5, %v2282_v4  ;;  %v1228_v14 = vpop.f32.mrf.mxu0 }
 0x2ea   :  { %1277 = vst [vmem:[#allocation12 + $0xd0] sm:$0xff] %v1178_v1  ;;  %v1229_v57 = vadd.f32 %v1228_v14, %v2287_v60 }
 0x2eb   :  { %1279 = vst [vmem:[#allocation12 + $0xe0] sm:$0xff] %v1082_v26 }
 0x2ec   :  { %v1543_v10 = vld [vmem:[#allocation2 + $0x38] sm:$0xff]  ;;  %1282 = vst [vmem:[#allocation12 + $0xf8] sm:$0xff] %v1229_v57 }
 0x2ed   :  { %1098 = vmatmul.bf16.gmra.mxu1 %v1543_v10  ;;  %1147 = vmatmul.bf16.gmra.mxu2 %v1543_v10 }
 0x2ee   :  { %1196 = vmatmul.bf16.gmra.mxu3 %v1543_v10  ;;  %1245 = vmatmul.bf16.gmra.mxu0 %v1543_v10  ;;  %v1130_v15 = vpop.f32.mrf.mxu2 }
 0x2ef   :  { %v1131_v17 = vadd.f32 %v1130_v15, %v2296_v42  ;;  %v1179_v16 = vpop.f32.mrf.mxu3 }
 0x2f0   :  { %v1180_v21 = vadd.f32 %v1179_v16, %v2298_v9 }
 0x2f1   :  { %1280 = vst [vmem:[#allocation12 + $0xe8] sm:$0xff] %v1131_v17  ;;  %v1084_v22 = vpop.f32.mrf.mxu1 }
 0x2f2   :  { %1281 = vst [vmem:[#allocation12 + $0xf0] sm:$0xff] %v1180_v21  ;;  %v1085_v24 = vadd.f32 %v1084_v22, %v2282_v4  ;;  %v1231_v12 = vpop.f32.mrf.mxu0 }
 0x2f3   :  { %v1232_v32 = vadd.f32 %v1231_v12, %v2287_v60 }
 0x2f4   :  { %1283 = vst [vmem:[#allocation12 + $0x100] sm:$0xff] %v1085_v24 }
 0x2f5   :  { %1286 = vst [vmem:[#allocation12 + $0x118] sm:$0xff] %v1232_v32 }
 0x2f7   :  { %v1133_v54 = vpop.f32.mrf.mxu2 }
 0x2f8   :  { %v1134_v58 = vadd.f32 %v1133_v54, %v2296_v42  ;;  %v1182_v19 = vpop.f32.mrf.mxu3 }
 0x2f9   :  { %v1183_v63 = vadd.f32 %v1182_v19, %v2298_v9  ;;  %v1086_v37 = vpop.f32.mrf.mxu1 }
 0x2fa   :  { %1284 = vst [vmem:[#allocation12 + $0x108] sm:$0xff] %v1134_v58  ;;  %v1087_v23 = vadd.f32 %v1086_v37, %v2282_v4  ;;  %v1233_v33 = vpop.f32.mrf.mxu0 }
 0x2fb   :  { %1285 = vst [vmem:[#allocation12 + $0x110] sm:$0xff] %v1183_v63  ;;  %v1234_v8 = vadd.f32 %v1233_v33, %v2287_v60 }
 0x2fc   :  { %1287 = vst [vmem:[#allocation12 + $0x120] sm:$0xff] %v1087_v23 }
 0x2fd   :  { %1290 = vst [vmem:[#allocation12 + $0x138] sm:$0xff] %v1234_v8 }
 0x2ff   :  { %v1135_v34 = vpop.f32.mrf.mxu2 }
 0x300   :  { %v1136_v28 = vadd.f32 %v1135_v34, %v2296_v42  ;;  %v1184_v35 = vpop.f32.mrf.mxu3 }
 0x301   :  { %v1185_v36 = vadd.f32 %v1184_v35, %v2298_v9  ;;  %v1089_v44 = vpop.f32.mrf.mxu1 }
 0x302   :  { %1288 = vst [vmem:[#allocation12 + $0x128] sm:$0xff] %v1136_v28  ;;  %v1090_v39 = vadd.f32 %v1089_v44, %v2282_v4  ;;  %v1236_v38 = vpop.f32.mrf.mxu0 }
 0x303   :  { %1289 = vst [vmem:[#allocation12 + $0x130] sm:$0xff] %v1185_v36  ;;  %v1237_v11 = vadd.f32 %v1236_v38, %v2287_v60 }
 0x304   :  { %1291 = vst [vmem:[#allocation12 + $0x140] sm:$0xff] %v1090_v39 }
 0x305   :  { %1294 = vst [vmem:[#allocation12 + $0x158] sm:$0xff] %v1237_v11 }
 0x307   :  { %v1138_v27 = vpop.f32.mrf.mxu2 }
 0x308   :  { %v1139_v29 = vadd.f32 %v1138_v27, %v2296_v42  ;;  %v1187_v25 = vpop.f32.mrf.mxu3 }
 0x309   :  { %v1188_v41 = vadd.f32 %v1187_v25, %v2298_v9  ;;  %v1091_v7 = vpop.f32.mrf.mxu1 }
 0x30a   :  { %1292 = vst [vmem:[#allocation12 + $0x148] sm:$0xff] %v1139_v29  ;;  %v1092_v45 = vadd.f32 %v1091_v7, %v2282_v4  ;;  %v1238_v48 = vpop.f32.mrf.mxu0 }
 0x30b   :  { %1293 = vst [vmem:[#allocation12 + $0x150] sm:$0xff] %v1188_v41  ;;  %v1239_v51 = vadd.f32 %v1238_v48, %v2287_v60 }
 0x30c   :  { %1295 = vst [vmem:[#allocation12 + $0x160] sm:$0xff] %v1092_v45 }
 0x30d   :  { %1298 = vst [vmem:[#allocation12 + $0x178] sm:$0xff] %v1239_v51 }
 0x30f   :  { %v1140_v52 = vpop.f32.mrf.mxu2 }
 0x310   :  { %v1141_v13 = vadd.f32 %v1140_v52, %v2296_v42  ;;  %v1189_v18 = vpop.f32.mrf.mxu3 }
 0x311   :  { %v1190_v46 = vadd.f32 %v1189_v18, %v2298_v9  ;;  %v1094_v31 = vpop.f32.mrf.mxu1 }
 0x312   :  { %1296 = vst [vmem:[#allocation12 + $0x168] sm:$0xff] %v1141_v13  ;;  %v1095_v62 = vadd.f32 %v1094_v31, %v2282_v4  ;;  %v1241_v30 = vpop.f32.mrf.mxu0 }
 0x313   :  { %1297 = vst [vmem:[#allocation12 + $0x170] sm:$0xff] %v1190_v46  ;;  %v1242_v49 = vadd.f32 %v1241_v30, %v2287_v60 }
 0x314   :  { %1299 = vst [vmem:[#allocation12 + $0x180] sm:$0xff] %v1095_v62 }
 0x315   :  { %1302 = vst [vmem:[#allocation12 + $0x198] sm:$0xff] %v1242_v49 }
 0x317   :  { %v1143_v6 = vpop.f32.mrf.mxu2 }
 0x318   :  { %v1144_v40 = vadd.f32 %v1143_v6, %v2296_v42  ;;  %v1192_v53 = vpop.f32.mrf.mxu3 }
 0x319   :  { %v1193_v61 = vadd.f32 %v1192_v53, %v2298_v9  ;;  %v1096_v56 = vpop.f32.mrf.mxu1 }
 0x31a   :  { %1300 = vst [vmem:[#allocation12 + $0x188] sm:$0xff] %v1144_v40  ;;  %v1097_v2 = vadd.f32 %v1096_v56, %v2282_v4  ;;  %v1243_v47 = vpop.f32.mrf.mxu0 }
 0x31b   :  { %1301 = vst [vmem:[#allocation12 + $0x190] sm:$0xff] %v1193_v61  ;;  %v1244_v3 = vadd.f32 %v1243_v47, %v2287_v60 }
 0x31c   :  { %1303 = vst [vmem:[#allocation12 + $0x1a0] sm:$0xff] %v1097_v2 }
 0x31d   :  { %1306 = vst [vmem:[#allocation12 + $0x1b8] sm:$0xff] %v1244_v3 }
 0x31f   :  { %v1145_v50 = vpop.f32.mrf.mxu2 }
 0x320   :  { %v1146_v59 = vadd.f32 %v1145_v50, %v2296_v42  ;;  %v1194_v55 = vpop.f32.mrf.mxu3 }
 0x321   :  { %v1195_v43 = vadd.f32 %v1194_v55, %v2298_v9 }
 0x322   :  { %1304 = vst [vmem:[#allocation12 + $0x1a8] sm:$0xff] %v1146_v59 }
 0x323   :  { %1305 = vst [vmem:[#allocation12 + $0x1b0] sm:$0xff] %v1195_v43 }
 0x36a   :  { %v1099_v20 = vpop.f32.mrf.mxu1 }
 0x36b   :  { %v1100_v0 = vadd.f32 %v1099_v20, %v2282_v4  ;;  %v1246_v1 = vpop.f32.mrf.mxu0 }
 0x36c   :  { %v1247_v5 = vadd.f32 %v1246_v1, %v2287_v60 }
 0x36d   :  { %1307 = vst [vmem:[#allocation12 + $0x1c0] sm:$0xff] %v1100_v0 }
 0x36e   :  { %1310 = vst [vmem:[#allocation12 + $0x1d8] sm:$0xff] %v1247_v5 }
 0x370   :  { %v1148_v26 = vpop.f32.mrf.mxu2 }
 0x371   :  { %v1149_v14 = vadd.f32 %v1148_v26, %v2296_v42  ;;  %v1197_v57 = vpop.f32.mrf.mxu3 }
 0x372   :  { %v1198_v10 = vadd.f32 %v1197_v57, %v2298_v9  ;;  %v1101_v15 = vpop.f32.mrf.mxu1 }
 0x373   :  { %1308 = vst [vmem:[#allocation12 + $0x1c8] sm:$0xff] %v1149_v14  ;;  %v1102_v17 = vadd.f32 %v1101_v15, %v2282_v4  ;;  %v1248_v16 = vpop.f32.mrf.mxu0 }
 0x374   :  { %1309 = vst [vmem:[#allocation12 + $0x1d0] sm:$0xff] %v1198_v10  ;;  %v1249_v21 = vadd.f32 %v1248_v16, %v2287_v60 }
 0x375   :  { %1311 = vst [vmem:[#allocation12 + $0x1e0] sm:$0xff] %v1102_v17 }
 0x376   :  { %1314 = vst [vmem:[#allocation12 + $0x1f8] sm:$0xff] %v1249_v21 }
 0x378   :  { %v1150_v22 = vpop.f32.mrf.mxu2 }
 0x379   :  { %v1151_v24 = vadd.f32 %v1150_v22, %v2296_v42  ;;  %v1199_v12 = vpop.f32.mrf.mxu3 }
 0x37a   :  { %v1200_v4 = vadd.f32 %v1199_v12, %v2298_v9 }
 0x37b   :  { %1312 = vst [vmem:[#allocation12 + $0x1e8] sm:$0xff] %v1151_v24 }
 0x37c   :  { %1313 = vst [vmem:[#allocation12 + $0x1f0] sm:$0xff] %v1200_v4 }
 0x37d   :  { %1327 = dma.vmem_to_hbm [thread:$0]  %s1320_s30, 8192, %s1322_s10, [#allocation5], %s1896_s11, %s1896_s11, %s1897_s12  }
 0x37e   :  { %1881 = dma.done.wait [#allocation5], 8192  }
 0x37f   :  { %1882 = vsyncadd [#allocation5], 4294959104 }
 0x380   :  { %1332 = vsyncpa [#allocation4], 1 }
 0x381   :  { %1333 = vsyncpa [#allocation7], 1 }
 0x382   :  { %1334 = vsyncpa [#allocation10], 1 }
 0x383   :  { %1335 = vsyncpa [#allocation5], 1 }

</bundles_post_ra>
